<compile_context>
chip_gen: v6e
topology: v6e:2x2x1
jax: 0.10.0
libtpu: 0.0.40
codegen_flags: <defaults>
</compile_context>

<pallas_src>
import functools

import jax
import jax.numpy as jnp
from jax.experimental import pallas as pl
from jax.experimental.pallas import tpu as pltpu

FEAT_DIM = 512
NUM_CLASSES = 2
FUSION_DIM = 2 * FEAT_DIM          # concat fusion
HIDDEN_DIM = FUSION_DIM // 2       # classifier hidden


# ----------------------------------------------------------------------------
# Fused kernel:
#   streamed per-row pixel-sum (GAP numerator) accumulation
#   -> branch projections + ReLU (== concat of the two branch features)
#   -> Linear(1024,512) + ReLU -> Dropout(id) -> Linear(512,2)
# ----------------------------------------------------------------------------
def _make_fused_kernel(hw_tile, lane_acc):
    def _accumulate(x_ref, g_ref):
        x = x_ref[...]                                     # (rows, hw_tile) f32
        if lane_acc:
            # Lane-aligned chunk adds on the VPU; no per-step XLU reduce and no
            # materialized f32 copy of the tile.
            acc = g_ref[...]                               # (rows, 128) f32
            for j in range(hw_tile // 128):
                acc = acc + x[:, 128 * j:128 * (j + 1)]
            g_ref[...] = acc
        else:
            # Fallback for hw not a multiple of 128 (single hw step).
            g_ref[...] += jnp.sum(x, axis=-1, keepdims=True)   # (rows, 1)

    def _total(g_ref):
        if lane_acc:
            # One cross-lane reduce per batch block (finish step only).
            return jnp.sum(g_ref[...], axis=-1, keepdims=True)
        return g_ref[...]

    def kernel(xs_ref, xf_ref, a_sp_ref, wr_sp_ref, a_fr_ref, wr_fr_ref,
               bc_ref, w1_ref, b1_ref, w2_ref, b2_ref,
               out_ref, gs_ref, gf_ref):
        k = pl.program_id(1)

        @pl.when(k == 0)
        def _init():
            gs_ref[...] = jnp.zeros_like(gs_ref)
            gf_ref[...] = jnp.zeros_like(gf_ref)

        _accumulate(xs_ref, gs_ref)
        _accumulate(xf_ref, gf_ref)

        @pl.when(k == pl.num_programs(1) - 1)
        def _finish():
            gs = _total(gs_ref)                 # (b_tile*c_sp, 1) pixel sums
            gf = _total(gf_ref)                 # (b_tile*c_fr, 1)

            # Branch projections in "row space":
            #   a_*  : (b_tile, rows) batch-selection matrices, pre-scaled 1/HW
            #   wr_* : per-row branch weights zero-padded into disjoint halves
            #          of the 1024-wide fusion axis
            # so a single ReLU reproduces
            #   concat(relu(gap_sp @ w_sp + b_sp), relu(gap_fr @ w_fr + b_fr))
            # with no reshape/relayout of the accumulator.
            fused = (jnp.dot(a_sp_ref[...], gs * wr_sp_ref[...],
                             preferred_element_type=jnp.float32)
                     + jnp.dot(a_fr_ref[...], gf * wr_fr_ref[...],
                               preferred_element_type=jnp.float32)
                     + bc_ref[...])
            fused = jnp.maximum(fused, 0.0)                     # (b_tile, 1024)

            # Classifier: Linear(1024,512) -> ReLU -> Dropout(id) -> Linear(512,2)
            h = jnp.dot(fused, w1_ref[...],
                        preferred_element_type=jnp.float32) + b1_ref[...]
            h = jnp.maximum(h, 0.0)                             # (b_tile, 512)
            out = jnp.dot(h, w2_ref[...],
                          preferred_element_type=jnp.float32) + b2_ref[...]
            out_ref[...] = out.astype(out_ref.dtype)            # (b_tile, 2)

    return kernel


# ----------------------------------------------------------------------------
# Tile pickers
# ----------------------------------------------------------------------------
def _pick_b_tile(b, max_rows=128):
    """Batch tile: multiple of 8 dividing b; >= 2 blocks when b >= 16 so the
    'parallel' batch axis can shard across both v7x TensorCores."""
    if b % 8 != 0:
        return b
    cap = max_rows
    if b >= 16:
        cap = min(cap, max(8, (b // 2) // 8 * 8))
    t = max(8, min(b, cap) // 8 * 8)
    while b % t != 0:
        t -= 8
    return t


def _pick_hw_tile(hw, rows_tot, stream_budget_bytes, max_lanes=8192):
    """Largest multiple of 128 dividing hw whose double-buffered f32 streamed
    tiles (both streams) fit in the given VMEM budget."""
    if hw % 128 != 0:
        return hw
    per_lane = 2 * rows_tot * 4            # 2 pipeline buffers, f32
    fit = max(128, stream_budget_bytes // per_lane)
    tile = max(128, min(hw, max_lanes, fit // 128 * 128))
    while hw % tile != 0:
        tile -= 128
    return tile


# ----------------------------------------------------------------------------
# Wrapper: full forward pass (fusion_type='concat', eval mode)
# ----------------------------------------------------------------------------
def dual_stream_forward(params, spatial_input, freq_input, *, hw_tile=None,
                        vmem_budget_bytes=24 * 1024 * 1024):
    B, c_sp, H, W = spatial_input.shape
    Bf, c_fr, Hf, Wf = freq_input.shape
    assert (B, H, W) == (Bf, Hf, Wf), "spatial/freq inputs must share batch and HxW"
    hw = H * W
    inv_hw = 1.0 / float(hw)

    # Native-dtype streams with batch*channel collapsed onto the sublane axis.
    # (B, C, H, W) -> (B*C, H*W) merges adjacent dims: no HBM pre-pass, and it
    # avoids the sublane padding a (b, C<8, hw) block layout would pay.
    xs = spatial_input.reshape(B * c_sp, hw).astype(jnp.float32)
    xf = freq_input.reshape(B * c_fr, hw).astype(jnp.float32)

    b_tile = _pick_b_tile(B)
    rows_sp = b_tile * c_sp
    rows_fr = b_tile * c_fr
    rows_tot = rows_sp + rows_fr

    # Host-built constants for the in-kernel "row space" branch projection.
    w_sp = params["w_sp"].astype(jnp.float32)                    # (c_sp, 512)
    w_fr = params["w_fr"].astype(jnp.float32)                    # (c_fr, 512)
    wr_sp = jnp.zeros((rows_sp, FUSION_DIM), jnp.float32)
    wr_sp = wr_sp.at[:, :FEAT_DIM].set(jnp.tile(w_sp, (b_tile, 1)))
    wr_fr = jnp.zeros((rows_fr, FUSION_DIM), jnp.float32)
    wr_fr = wr_fr.at[:, FEAT_DIM:].set(jnp.tile(w_fr, (b_tile, 1)))
    a_sp = jnp.repeat(jnp.eye(b_tile, dtype=jnp.float32), c_sp, axis=1) * inv_hw
    a_fr = jnp.repeat(jnp.eye(b_tile, dtype=jnp.float32), c_fr, axis=1) * inv_hw
    bc = jnp.concatenate([params["b_sp"], params["b_fr"]], axis=1).astype(jnp.float32)

    w1 = params["w1"].astype(jnp.float32)
    b1 = params["b1"].astype(jnp.float32)
    w2 = params["w2"].astype(jnp.float32)
    b2 = params["b2"].astype(jnp.float32)

    # VMEM-aware hw tile: constants counted double-buffered (pipeline default).
    const_bytes = 4 * 2 * (a_sp.size + a_fr.size + wr_sp.size + wr_fr.size
                           + bc.size + w1.size + b1.size + w2.size + b2.size)
    scratch_bytes = 4 * rows_tot * 128
    if hw_tile is None:
        hw_tile = _pick_hw_tile(
            hw, rows_tot, vmem_budget_bytes - const_bytes - scratch_bytes)
    assert hw % hw_tile == 0, (hw, hw_tile)
    lane_acc = (hw_tile % 128 == 0)
    acc_lanes = 128 if lane_acc else 1

    grid = (B // b_tile, hw // hw_tile)
    kernel = _make_fused_kernel(hw_tile, lane_acc)

    flops = (B * (c_sp + c_fr) * hw
             + 2 * B * ((c_sp + c_fr) * FUSION_DIM
                        + FUSION_DIM * HIDDEN_DIM + HIDDEN_DIM * NUM_CLASSES))
    bytes_accessed = 4 * (xs.size + xf.size + a_sp.size + a_fr.size + wr_sp.size
                          + wr_fr.size + bc.size + w1.size + b1.size + w2.size
                          + b2.size + B * NUM_CLASSES)

    def const_spec(shape):
        return pl.BlockSpec(shape, lambda b, k: (0, 0))

    grid_spec = pltpu.PrefetchScalarGridSpec(
        num_scalar_prefetch=0,
        grid=grid,
        in_specs=[
            # streamed image tiles (lane-dense, sublane-dense)
            pl.BlockSpec((rows_sp, hw_tile), lambda b, k: (b, k)),
            pl.BlockSpec((rows_fr, hw_tile), lambda b, k: (b, k)),
            # small VMEM-resident constants
            const_spec((b_tile, rows_sp)),
            const_spec((rows_sp, FUSION_DIM)),
            const_spec((b_tile, rows_fr)),
            const_spec((rows_fr, FUSION_DIM)),
            const_spec((1, FUSION_DIM)),
            const_spec((FUSION_DIM, HIDDEN_DIM)),
            const_spec((1, HIDDEN_DIM)),
            const_spec((HIDDEN_DIM, NUM_CLASSES)),
            const_spec((1, NUM_CLASSES)),
        ],
        out_specs=pl.BlockSpec((b_tile, NUM_CLASSES), lambda b, k: (b, 0)),
        scratch_shapes=[pltpu.VMEM((rows_sp, acc_lanes), jnp.float32),
                        pltpu.VMEM((rows_fr, acc_lanes), jnp.float32)],
    )

    return pl.pallas_call(
        kernel,
        out_shape=jax.ShapeDtypeStruct((B, NUM_CLASSES), jnp.float32),
        grid_spec=grid_spec,
        compiler_params=pltpu.CompilerParams(
            # batch axis shards across TensorCores (v7x); HW axis is a reduction
            dimension_semantics=("parallel", "arbitrary"),
            vmem_limit_bytes=32 * 1024 * 1024,
        ),
        cost_estimate=pl.CostEstimate(flops=flops, transcendentals=0,
                                      bytes_accessed=bytes_accessed),
    )(xs, xf, a_sp, wr_sp, a_fr, wr_fr, bc, w1, b1, w2, b2)


# ----------------------------------------------------------------------------
# Parameter init (independent keys for each weight / bias)
# ----------------------------------------------------------------------------
def init_params(key, spatial_channels=3, freq_channels=1):
    ks = jax.random.split(key, 8)

    def lin(k, fan_in, shape):
        bound = 1.0 / jnp.sqrt(fan_in)
        return jax.random.uniform(k, shape, jnp.float32, -bound, bound)

    return {
        # stand-in backbone projectors (C -> 512)
        "w_sp": lin(ks[0], spatial_channels, (spatial_channels, FEAT_DIM)),
        "b_sp": lin(ks[1], spatial_channels, (1, FEAT_DIM)),
        "w_fr": lin(ks[2], freq_channels, (freq_channels, FEAT_DIM)),
        "b_fr": lin(ks[3], freq_channels, (1, FEAT_DIM)),
        # classifier: Linear(1024, 512) -> ReLU -> Dropout -> Linear(512, 2)
        "w1": lin(ks[4], FUSION_DIM, (FUSION_DIM, HIDDEN_DIM)),
        "b1": lin(ks[5], FUSION_DIM, (1, HIDDEN_DIM)),
        "w2": lin(ks[6], HIDDEN_DIM, (HIDDEN_DIM, NUM_CLASSES)),
        "b2": lin(ks[7], HIDDEN_DIM, (1, NUM_CLASSES)),
    }


# Pure-JAX reference of the same stand-in forward (for a sanity check).
def _reference_forward(params, spatial_input, freq_input):
    gap_sp = jnp.mean(spatial_input.astype(jnp.float32), axis=(2, 3))
    gap_fr = jnp.mean(freq_input.astype(jnp.float32), axis=(2, 3))
    f_sp = jax.nn.relu(gap_sp @ params["w_sp"] + params["b_sp"])
    f_fr = jax.nn.relu(gap_fr @ params["w_fr"] + params["b_fr"])
    fused = jnp.concatenate([f_sp, f_fr], axis=1)
    h = jax.nn.relu(fused @ params["w1"] + params["b1"])
    return h @ params["w2"] + params["b2"]


if __name__ == "__main__":
    key = jax.random.PRNGKey(0)
    k_param, k_sp, k_fr = jax.random.split(key, 3)

    # NOTE: at B=2 the kernel is latency-bound; batch multiple requests per
    # call (B >= 16) to use both v7x TensorCores and reach throughput regime.
    B, H, W = 2, 16, 16
    spatial_input = jax.random.normal(k_sp, (B, 3, H, W), jnp.float32)   # NCHW RGB
    freq_input = jax.random.normal(k_fr, (B, 1, H, W), jnp.float32)      # NCHW freq

    params = init_params(k_param)

    # hw_tile=128 -> 2-step streamed GAP, exercising the accumulation grid.
    fwd = jax.jit(functools.partial(dual_stream_forward, hw_tile=128))
    logits = jax.block_until_ready(fwd(params, spatial_input, freq_input))

    assert logits.shape == (B, NUM_CLASSES), logits.shape
    assert bool(jnp.all(jnp.isfinite(logits)))
    ref = _reference_forward(params, spatial_input, freq_input)
    assert bool(jnp.allclose(logits, ref, rtol=2e-2, atol=1e-2)), (logits, ref)
    print("KERNEL_OK")
</pallas_src>

<mosaic_0001>
module attributes {stable_mosaic.version = 11 : i64} {
  func.func @kernel(%arg0: i32, %arg1: i32, %arg2: memref<6x128xf32, #tpu.memory_space<vmem>>, %arg3: memref<2x128xf32, #tpu.memory_space<vmem>>, %arg4: memref<2x6xf32, #tpu.memory_space<vmem>>, %arg5: memref<6x1024xf32, #tpu.memory_space<vmem>>, %arg6: memref<2x2xf32, #tpu.memory_space<vmem>>, %arg7: memref<2x1024xf32, #tpu.memory_space<vmem>>, %arg8: memref<1x1024xf32, #tpu.memory_space<vmem>>, %arg9: memref<1024x512xf32, #tpu.memory_space<vmem>>, %arg10: memref<1x512xf32, #tpu.memory_space<vmem>>, %arg11: memref<512x2xf32, #tpu.memory_space<vmem>>, %arg12: memref<1x2xf32, #tpu.memory_space<vmem>>, %arg13: memref<2x2xf32, #tpu.memory_space<vmem>>, %arg14: memref<6x128xf32, #tpu.memory_space<vmem>>, %arg15: memref<2x128xf32, #tpu.memory_space<vmem>>) attributes {dimension_semantics = [#tpu.dimension_semantics<parallel>, #tpu.dimension_semantics<arbitrary>], iteration_bounds = array<i64: 1, 2>, scalar_prefetch = 0 : i64, scratch_operands = 2 : i64, tpu.core_type = #tpu.core_type<tc>, window_params = [{transform_indices = @transform_0, window_bounds = array<i64: 6, 128>}, {transform_indices = @transform_1, window_bounds = array<i64: 2, 128>}, {pipeline_mode = #tpu.pipeline_mode<synchronous>, transform_indices = @transform_2, window_bounds = array<i64: 2, 6>}, {pipeline_mode = #tpu.pipeline_mode<synchronous>, transform_indices = @transform_3, window_bounds = array<i64: 6, 1024>}, {pipeline_mode = #tpu.pipeline_mode<synchronous>, transform_indices = @transform_4, window_bounds = array<i64: 2, 2>}, {pipeline_mode = #tpu.pipeline_mode<synchronous>, transform_indices = @transform_5, window_bounds = array<i64: 2, 1024>}, {pipeline_mode = #tpu.pipeline_mode<synchronous>, transform_indices = @transform_6, window_bounds = array<i64: 1, 1024>}, {pipeline_mode = #tpu.pipeline_mode<synchronous>, transform_indices = @transform_7, window_bounds = array<i64: 1024, 512>}, {pipeline_mode = #tpu.pipeline_mode<synchronous>, transform_indices = @transform_8, window_bounds = array<i64: 1, 512>}, {pipeline_mode = #tpu.pipeline_mode<synchronous>, transform_indices = @transform_9, window_bounds = array<i64: 512, 2>}, {pipeline_mode = #tpu.pipeline_mode<synchronous>, transform_indices = @transform_10, window_bounds = array<i64: 1, 2>}, {transform_indices = @transform_11, window_bounds = array<i64: 2, 2>}]} {
    %c0_i32 = arith.constant 0 : i32
    %0 = arith.cmpi eq, %arg1, %c0_i32 : i32
    %1 = arith.extui %0 : i1 to i32
    %c0_i32_0 = arith.constant 0 : i32
    %2 = arith.cmpi ne, %1, %c0_i32_0 : i32
    scf.if %2 {
      %cst = arith.constant 0.000000e+00 : f32
      %14 = vector.broadcast %cst : f32 to vector<6x128xf32>
      %c0_13 = arith.constant 0 : index
      %c0_14 = arith.constant 0 : index
      %15 = vector.load %arg14[%c0_13, %c0_14] : memref<6x128xf32, #tpu.memory_space<vmem>>, vector<6x128xf32>
      tpu.vector_store %arg14[%c0_13, %c0_14], %14 {strides = array<i32>} : memref<6x128xf32, #tpu.memory_space<vmem>>, vector<6x128xf32>,
      %cst_15 = arith.constant 0.000000e+00 : f32
      %16 = vector.broadcast %cst_15 : f32 to vector<2x128xf32>
      %c0_16 = arith.constant 0 : index
      %c0_17 = arith.constant 0 : index
      %17 = vector.load %arg15[%c0_16, %c0_17] : memref<2x128xf32, #tpu.memory_space<vmem>>, vector<2x128xf32>
      tpu.vector_store %arg15[%c0_16, %c0_17], %16 {strides = array<i32>} : memref<2x128xf32, #tpu.memory_space<vmem>>, vector<2x128xf32>,
    } else {
    }
    %c0 = arith.constant 0 : index
    %c0_1 = arith.constant 0 : index
    %3 = vector.load %arg2[%c0, %c0_1] : memref<6x128xf32, #tpu.memory_space<vmem>>, vector<6x128xf32>
    %c0_2 = arith.constant 0 : index
    %c0_3 = arith.constant 0 : index
    %4 = vector.load %arg14[%c0_2, %c0_3] : memref<6x128xf32, #tpu.memory_space<vmem>>, vector<6x128xf32>
    %5 = arith.addf %4, %3 : vector<6x128xf32>
    %c0_4 = arith.constant 0 : index
    %c0_5 = arith.constant 0 : index
    %6 = vector.load %arg14[%c0_4, %c0_5] : memref<6x128xf32, #tpu.memory_space<vmem>>, vector<6x128xf32>
    tpu.vector_store %arg14[%c0_4, %c0_5], %5 {strides = array<i32>} : memref<6x128xf32, #tpu.memory_space<vmem>>, vector<6x128xf32>,
    %c0_6 = arith.constant 0 : index
    %c0_7 = arith.constant 0 : index
    %7 = vector.load %arg3[%c0_6, %c0_7] : memref<2x128xf32, #tpu.memory_space<vmem>>, vector<2x128xf32>
    %c0_8 = arith.constant 0 : index
    %c0_9 = arith.constant 0 : index
    %8 = vector.load %arg15[%c0_8, %c0_9] : memref<2x128xf32, #tpu.memory_space<vmem>>, vector<2x128xf32>
    %9 = arith.addf %8, %7 : vector<2x128xf32>
    %c0_10 = arith.constant 0 : index
    %c0_11 = arith.constant 0 : index
    %10 = vector.load %arg15[%c0_10, %c0_11] : memref<2x128xf32, #tpu.memory_space<vmem>>, vector<2x128xf32>
    tpu.vector_store %arg15[%c0_10, %c0_11], %9 {strides = array<i32>} : memref<2x128xf32, #tpu.memory_space<vmem>>, vector<2x128xf32>,
    %c1_i32 = arith.constant 1 : i32
    %11 = arith.cmpi eq, %arg1, %c1_i32 : i32
    %12 = arith.extui %11 : i1 to i32
    %c0_i32_12 = arith.constant 0 : i32
    %13 = arith.cmpi ne, %12, %c0_i32_12 : i32
    scf.if %13 {
      %c0_13 = arith.constant 0 : index
      %c0_14 = arith.constant 0 : index
      %14 = vector.load %arg14[%c0_13, %c0_14] : memref<6x128xf32, #tpu.memory_space<vmem>>, vector<6x128xf32>
      %cst = arith.constant dense<0.000000e+00> : vector<6xf32>
      %15 = vector.multi_reduction <add>, %14, %cst [1] : vector<6x128xf32> to vector<6xf32>
      %16 = vector.shape_cast %15 : vector<6xf32> to vector<6x1xf32>
      %c0_15 = arith.constant 0 : index
      %c0_16 = arith.constant 0 : index
      %17 = vector.load %arg15[%c0_15, %c0_16] : memref<2x128xf32, #tpu.memory_space<vmem>>, vector<2x128xf32>
      %cst_17 = arith.constant dense<0.000000e+00> : vector<2xf32>
      %18 = vector.multi_reduction <add>, %17, %cst_17 [1] : vector<2x128xf32> to vector<2xf32>
      %19 = vector.shape_cast %18 : vector<2xf32> to vector<2x1xf32>
      %c0_18 = arith.constant 0 : index
      %c0_19 = arith.constant 0 : index
      %20 = vector.load %arg4[%c0_18, %c0_19] : memref<2x6xf32, #tpu.memory_space<vmem>>, vector<2x6xf32>
      %c0_20 = arith.constant 0 : index
      %c0_21 = arith.constant 0 : index
      %21 = vector.load %arg5[%c0_20, %c0_21] : memref<6x1024xf32, #tpu.memory_space<vmem>>, vector<6x1024xf32>
      %22 = vector.broadcast %16 : vector<6x1xf32> to vector<6x1024xf32>
      %23 = arith.mulf %22, %21 : vector<6x1024xf32>
      %cst_22 = arith.constant dense<0.000000e+00> : vector<2x1024xf32>
      %24 = tpu.matmul %20, %23, %cst_22 {dimension_numbers = #tpu.dot_dimension_numbers<[1], [0], [0], [1], [0, 0, 1, 1], [], []>} : vector<2x6xf32>, vector<6x1024xf32>, vector<2x1024xf32> -> vector<2x1024xf32>
      %c0_23 = arith.constant 0 : index
      %c0_24 = arith.constant 0 : index
      %25 = vector.load %arg6[%c0_23, %c0_24] : memref<2x2xf32, #tpu.memory_space<vmem>>, vector<2x2xf32>
      %c0_25 = arith.constant 0 : index
      %c0_26 = arith.constant 0 : index
      %26 = vector.load %arg7[%c0_25, %c0_26] : memref<2x1024xf32, #tpu.memory_space<vmem>>, vector<2x1024xf32>
      %27 = vector.broadcast %19 : vector<2x1xf32> to vector<2x1024xf32>
      %28 = arith.mulf %27, %26 : vector<2x1024xf32>
      %cst_27 = arith.constant dense<0.000000e+00> : vector<2x1024xf32>
      %29 = tpu.matmul %25, %28, %cst_27 {dimension_numbers = #tpu.dot_dimension_numbers<[1], [0], [0], [1], [0, 0, 1, 1], [], []>} : vector<2x2xf32>, vector<2x1024xf32>, vector<2x1024xf32> -> vector<2x1024xf32>
      %30 = arith.addf %24, %29 : vector<2x1024xf32>
      %c0_28 = arith.constant 0 : index
      %c0_29 = arith.constant 0 : index
      %31 = vector.load %arg8[%c0_28, %c0_29] : memref<1x1024xf32, #tpu.memory_space<vmem>>, vector<1x1024xf32>
      %32 = vector.broadcast %31 : vector<1x1024xf32> to vector<2x1024xf32>
      %33 = arith.addf %30, %32 : vector<2x1024xf32>
      %cst_30 = arith.constant 0.000000e+00 : f32
      %34 = vector.broadcast %cst_30 : f32 to vector<2x1024xf32>
      %35 = arith.maximumf %33, %34 : vector<2x1024xf32>
      %c0_31 = arith.constant 0 : index
      %c0_32 = arith.constant 0 : index
      %36 = vector.load %arg9[%c0_31, %c0_32] : memref<1024x512xf32, #tpu.memory_space<vmem>>, vector<1024x512xf32>
      %cst_33 = arith.constant dense<0.000000e+00> : vector<2x512xf32>
      %37 = tpu.matmul %35, %36, %cst_33 {dimension_numbers = #tpu.dot_dimension_numbers<[1], [0], [0], [1], [0, 0, 1, 1], [], []>} : vector<2x1024xf32>, vector<1024x512xf32>, vector<2x512xf32> -> vector<2x512xf32>
      %c0_34 = arith.constant 0 : index
      %c0_35 = arith.constant 0 : index
      %38 = vector.load %arg10[%c0_34, %c0_35] : memref<1x512xf32, #tpu.memory_space<vmem>>, vector<1x512xf32>
      %39 = vector.broadcast %38 : vector<1x512xf32> to vector<2x512xf32>
      %40 = arith.addf %37, %39 : vector<2x512xf32>
      %cst_36 = arith.constant 0.000000e+00 : f32
      %41 = vector.broadcast %cst_36 : f32 to vector<2x512xf32>
      %42 = arith.maximumf %40, %41 : vector<2x512xf32>
      %c0_37 = arith.constant 0 : index
      %c0_38 = arith.constant 0 : index
      %43 = vector.load %arg11[%c0_37, %c0_38] : memref<512x2xf32, #tpu.memory_space<vmem>>, vector<512x2xf32>
      %cst_39 = arith.constant dense<0.000000e+00> : vector<2x2xf32>
      %44 = tpu.matmul %42, %43, %cst_39 {dimension_numbers = #tpu.dot_dimension_numbers<[1], [0], [0], [1], [0, 0, 1, 1], [], []>} : vector<2x512xf32>, vector<512x2xf32>, vector<2x2xf32> -> vector<2x2xf32>
      %c0_40 = arith.constant 0 : index
      %c0_41 = arith.constant 0 : index
      %45 = vector.load %arg12[%c0_40, %c0_41] : memref<1x2xf32, #tpu.memory_space<vmem>>, vector<1x2xf32>
      %46 = vector.broadcast %45 : vector<1x2xf32> to vector<2x2xf32>
      %47 = arith.addf %44, %46 : vector<2x2xf32>
      %c0_42 = arith.constant 0 : index
      %c0_43 = arith.constant 0 : index
      %48 = vector.load %arg13[%c0_42, %c0_43] : memref<2x2xf32, #tpu.memory_space<vmem>>, vector<2x2xf32>
      tpu.vector_store %arg13[%c0_42, %c0_43], %47 {strides = array<i32>} : memref<2x2xf32, #tpu.memory_space<vmem>>, vector<2x2xf32>,
    } else {
    }
    return
  }
  func.func @transform_0(%arg0: i32, %arg1: i32) -> (i32, i32) {
    %c0_i32 = arith.constant 0 : i32
    return %arg0, %arg1 : i32, i32
  }
  func.func @transform_1(%arg0: i32, %arg1: i32) -> (i32, i32) {
    %c0_i32 = arith.constant 0 : i32
    return %arg0, %arg1 : i32, i32
  }
  func.func @transform_2(%arg0: i32, %arg1: i32) -> (i32, i32) {
    %c0_i32 = arith.constant 0 : i32
    %c0_i32_0 = arith.constant 0 : i32
    %c0_i32_1 = arith.constant 0 : i32
    return %c0_i32, %c0_i32_0 : i32, i32
  }
  func.func @transform_3(%arg0: i32, %arg1: i32) -> (i32, i32) {
    %c0_i32 = arith.constant 0 : i32
    %c0_i32_0 = arith.constant 0 : i32
    %c0_i32_1 = arith.constant 0 : i32
    return %c0_i32, %c0_i32_0 : i32, i32
  }
  func.func @transform_4(%arg0: i32, %arg1: i32) -> (i32, i32) {
    %c0_i32 = arith.constant 0 : i32
    %c0_i32_0 = arith.constant 0 : i32
    %c0_i32_1 = arith.constant 0 : i32
    return %c0_i32, %c0_i32_0 : i32, i32
  }
  func.func @transform_5(%arg0: i32, %arg1: i32) -> (i32, i32) {
    %c0_i32 = arith.constant 0 : i32
    %c0_i32_0 = arith.constant 0 : i32
    %c0_i32_1 = arith.constant 0 : i32
    return %c0_i32, %c0_i32_0 : i32, i32
  }
  func.func @transform_6(%arg0: i32, %arg1: i32) -> (i32, i32) {
    %c0_i32 = arith.constant 0 : i32
    %c0_i32_0 = arith.constant 0 : i32
    %c0_i32_1 = arith.constant 0 : i32
    return %c0_i32, %c0_i32_0 : i32, i32
  }
  func.func @transform_7(%arg0: i32, %arg1: i32) -> (i32, i32) {
    %c0_i32 = arith.constant 0 : i32
    %c0_i32_0 = arith.constant 0 : i32
    %c0_i32_1 = arith.constant 0 : i32
    return %c0_i32, %c0_i32_0 : i32, i32
  }
  func.func @transform_8(%arg0: i32, %arg1: i32) -> (i32, i32) {
    %c0_i32 = arith.constant 0 : i32
    %c0_i32_0 = arith.constant 0 : i32
    %c0_i32_1 = arith.constant 0 : i32
    return %c0_i32, %c0_i32_0 : i32, i32
  }
  func.func @transform_9(%arg0: i32, %arg1: i32) -> (i32, i32) {
    %c0_i32 = arith.constant 0 : i32
    %c0_i32_0 = arith.constant 0 : i32
    %c0_i32_1 = arith.constant 0 : i32
    return %c0_i32, %c0_i32_0 : i32, i32
  }
  func.func @transform_10(%arg0: i32, %arg1: i32) -> (i32, i32) {
    %c0_i32 = arith.constant 0 : i32
    %c0_i32_0 = arith.constant 0 : i32
    %c0_i32_1 = arith.constant 0 : i32
    return %c0_i32, %c0_i32_0 : i32, i32
  }
  func.func @transform_11(%arg0: i32, %arg1: i32) -> (i32, i32) {
    %c0_i32 = arith.constant 0 : i32
    %c0_i32_0 = arith.constant 0 : i32
    return %arg0, %c0_i32 : i32, i32
  }
}

</mosaic_0001>

<bundles_post_ra>
// kernel: dual_stream_forward.1
= control target key start
LH: loop header
LB: loop body
LE: loop exit
PB: predicated region body
PF: predicated region fallthrough
CT: control target
= control target key end

     0   :  { %16 = vsyncpa [#allocation5], 0  ;;  %s3541_s0 = inlined_call_operand.vmem [shape: f32[6,256], index: 0, kind: input, shape index: {}]   ;;  %s3542_s1 = inlined_call_operand.vmem [shape: f32[2,256], index: 1, kind: input, shape index: {}]   ;;  %s3543_s2 = inlined_call_operand.vmem [shape: f32[2,6], index: 2, kind: input, shape index: {}]   ;;  %s3544_s3 = inlined_call_operand.vmem [shape: f32[6,1024], index: 3, kind: input, shape index: {}]   ;;  %s3545_s4 = inlined_call_operand.vmem [shape: f32[2,2], index: 4, kind: input, shape index: {}]   ;;  %s3546_s5 = inlined_call_operand.vmem [shape: f32[2,1024], index: 5, kind: input, shape index: {}]   ;;  %s3547_s6 = inlined_call_operand.vmem [shape: f32[1,1024], index: 6, kind: input, shape index: {}]   ;;  %s3548_s7 = inlined_call_operand.hbm [shape: f32[1024,512], index: 7, kind: input, shape index: {}]   ;;  %s3549_s8 = inlined_call_operand.hbm [shape: f32[1,512], index: 8, kind: input, shape index: {}]   ;;  %s3550_s9 = inlined_call_operand.vmem [shape: f32[512,2], index: 9, kind: input, shape index: {}]   ;;  %s3551_s10 = inlined_call_operand.hbm [shape: f32[1,2], index: 10, kind: input, shape index: {}]   ;;  %s3552_s11 = inlined_call_operand.hbm [shape: f32[2,2], index: 11, kind: output, shape index: {}]  }
   0x1   :  { %17 = vsyncpa [#allocation8], 0 }
   0x2   :  { %18 = vsyncpa [#allocation6], 0  ;;  %s3076_s17 = smov 0   ;;  %s3078_s18 = smov 0  }
   0x3   :  { %s3080_s19 = smov 0  }
   0x4 LB: > { %s3007_s20 = smov [#allocation7]   ;;  %s2687_s22 = sadd.s32 4294967295, %s3005_s19   ;;  %s3005_s19 = sphi %s3080_s19, %s24_s19   ;;  %s3001_s18 = sphi %s3078_s18, %s3559_s18   ;;  %s2997_s17 = sphi %s3076_s17, %s3558_s17  }
   0x5   : > { %s353_s21 = sshll.u32 %s3007_s20, 4  ;;  %p2688_p0 = scmp.ge.s32.totalorder %s3005_s19, 1  ;;  %s354_s21 = int_to_ptr.vmem [resolvable:$true] %s353_s21 }
   0x6   : > { %p312_p1 = scmp.lt.s32.totalorder %s3005_s19, 3  ;;  %p3096_p2 = scmp.eq.s32.totalorder %s2687_s22, 0 }
   0x7   : > { %s33_s25 = sadd.s32 1, %s3001_s18  ;;  %s3008_s28 = smov [#allocation4]  }
   0x8   : > { %p3100_p3 = pnand %p2688_p0, %p312_p1  ;;  %p3113_p6 = scmp.ge.s32.totalorder %s33_s25, 2 }
   0x9   : > { %s339_s29 = sshll.u32 %s3008_s28, 4  ;;  %s2880_s30 = scalar_lea.vmem %s354_s21, 64  ;;  %s340_s29 = int_to_ptr.vmem [resolvable:$true] %s339_s29 }
   0xa   : > { %p2816_p4 = pneg %p3100_p3  ;;  %p2881_p8 = scmp.ne.s32.totalorder %s354_s21, %s2880_s30 }
   0xb   : > { %p2888_p11 = scmp.lt.s32.totalorder %s354_s21, %s354_s21  ;;  %p2889_p12 = scmp.lt.s32.totalorder %s2880_s30, %s2880_s30 }
   0xc   : > { %p3109_p5 = pnand %p3096_p2, %p2816_p4 }
   0xd   : > { %p2890_p13 = por %p2889_p12, %p2888_p11 }
   0xe   : > { %p2871_p7 = pneg %p3109_p5 }
  0x10   : > { %p2883_p9 = pnand %p2881_p8, %p2871_p7 }
  0x12   : > { %p2884_p10 = pneg %p2883_p9 }
  0x14   : > { %p2891_p0 = pnand %p2890_p13, %p2884_p10 }
  0x16   : > { %2894 = shalt.err (!%p2891_p0)
}
  0x17   : > { %2822 = dma.hbm_to_vmem [thread:$0]  (!%p3109_p5), %s3549_s8, 64, %s354_s21, [#allocation8]  }
  0x18   : > { %s3561_s25 = smov (%p3113_p6, %s33_s25), 0  ;;  %s2906_s14 = scalar_lea.vmem %s340_s29, 65536 }
  0x19   : > { %p2907_p1 = scmp.ne.s32.totalorder %s340_s29, %s2906_s14  ;;  %p2914_p9 = scmp.lt.s32.totalorder %s340_s29, %s340_s29 }
  0x1a   : > { %p2915_p10 = scmp.lt.s32.totalorder %s2906_s14, %s2906_s14 }
  0x1b   : > { %p2909_p4 = pnand %p2907_p1, %p2871_p7 }
  0x1c   : > { %p2916_p11 = por %p2915_p10, %p2914_p9 }
  0x1d   : > { %p2910_p8 = pneg %p2909_p4 }
  0x1f   : > { %p2917_p12 = pnand %p2916_p11, %p2910_p8 }
  0x21   : > { %2920 = shalt.err (!%p2917_p12)
}
  0x22   : > { %s3009_s15 = smov 512   ;;  %s3010_s16 = smov 32  }
  0x23   : > { %2819 = dma.hbm_to_vmem [thread:$0]  (!%p3109_p5), %s3548_s7, 65536, %s340_s29, [#allocation5], %s3009_s15, %s3009_s15, %s3010_s16  }
  0x24   : > { %s3011_s27 = smov [#allocation9]  }
  0x25   : > { %s367_s28 = sshll.u32 %s3011_s27, 4  ;;  %s368_s28 = int_to_ptr.vmem [resolvable:$true] %s367_s28 }
  0x26   : > { %s2932_s30 = scalar_lea.vmem %s368_s28, 16  ;;  %s2939_s12 = scalar_lea.vmem %s368_s28, 32 }
  0x27   : > { %p2933_p6 = scmp.ne.s32.totalorder %s368_s28, %s2932_s30  ;;  %p2940_p1 = scmp.lt.s32.totalorder %s368_s28, %s368_s28 }
  0x28   : > { %p2941_p4 = scmp.lt.s32.totalorder %s2939_s12, %s2932_s30 }
  0x29   : > { %p2935_p13 = pnand %p2933_p6, %p2871_p7 }
  0x2a   : > { %p2942_p8 = por %p2941_p4, %p2940_p1 }
  0x2b   : > { %p2936_p0 = pneg %p2935_p13 }
  0x2d   : > { %p2943_p9 = pnand %p2942_p8, %p2936_p0 }
  0x2f   : > { %2946 = shalt.err (!%p2943_p9)
}
  0x30   : > { %2825 = dma.hbm_to_vmem [thread:$0]  (!%p3109_p5), %s3551_s10, 16, %s368_s28, [#allocation8]  }
  0x31   : > { %402 = sbr.rel (%p3100_p3) target bundleno = 1052 (0x41c), region = 64 }
  0x36   : > { %2984 = dma.done.wait (%p3096_p2), [#allocation5], 65536  }
  0x37   : > { %2986 = vsyncadd (%p3096_p2), [#allocation5], 4294901760 }
  0x38   : > { %2988 = dma.done.wait (%p3096_p2), [#allocation8], 80  }
  0x39   : > { %2990 = vsyncadd (%p3096_p2), [#allocation8], 4294967216  ;;  %p458_p7 = scmp.lt.s32.totalorder %s2997_s17, 1  ;;  %p2699_p3 = scmp.ne.s32.totalorder %s2997_s17, 0 }
  0x3b   : > { %s459_s26 = scalar_select %p458_p7, %s2997_s17, 1 }
  0x3c   : > { %475 = sbr.rel (%p2699_p3) target bundleno = 67 (0x43), region = 80 }
  0x3d   : > { %s2697_s29 = sshll.u32 %s459_s26, 3  ;;  %s2698_s15 = sshll.u32 %s459_s26, 1 }
  0x3e   : > { %s463_s20 = scalar_lea.vmem %s3541_s0, %s2697_s29  ;;  %s471_s28 = scalar_lea.vmem %s3542_s1, %s2698_s15 }
  0x41   : > { %v3012_v0 = vmov 0.0  }
  0x42   : > { %476 = vst [vmem:[#allocation2] sm:$0x3f] %v3012_v0  ;;  %477 = vst [vmem:[#allocation3] sm:$0x3] %v3012_v0 }
  0x43 PF: > { %v478_v1 = vld [vmem:[%s463_s20] sm:$0x3f]  ;;  %p2700_p2 = scmp.ne.s32.totalorder %s2997_s17, 1 }
  0x44   : > { %v482_v3 = vld [vmem:[%s471_s28] sm:$0x3] }
  0x48   : > { %489 = sbr.rel (%p2700_p2) target bundleno = 1037 (0x40d), region = 84 }
  0x49   : > { %v479_v2 = vld [vmem:[#allocation2] sm:$0x3f]  ;;  %v483_v5 = vld [vmem:[#allocation3] sm:$0x3] }
  0x4a   : > { %v480_v4 = vadd.f32 %v479_v2, %v478_v1  ;;  %v484_v6 = vadd.f32 %v483_v5, %v482_v3 }
  0x4c   : > { %481 = vst [vmem:[#allocation2] sm:$0x3f] %v480_v4  ;;  %485 = vst [vmem:[#allocation3] sm:$0x3] %v484_v6 }
  0x4d   : > { %vm496_vm0 = vcmask 1041408   ;;  %vm491_vm1 = vcmask 1045504   ;;  %v3013_v11 = vmov 0.0   ;;  %v3014_v12 = vmov 1983009808   ;;  %v518_v17 = vld [vmem:[%s3546_s5] sm:$0xff] }
  0x4e   : > { %664 = vmatprep.mubr.f32.mxu0 %v3013_v11  ;;  %735 = vmatprep.mubr.f32.mxu1 %v3013_v11  ;;  %v524_v13 = vunpack.c.l.s4 %v3014_v12  ;;  %v526_v14 = vlaneseq  ;;  %v522_v19 = vcombine.high %v518_v17, %v518_v17  ;;  %v519_v20 = vld [vmem:[%s3546_s5 + $0x8] sm:$0xff]  ;;  %v517_v35 = vld [vmem:[%s3545_s4] sm:$0x3]  ;;  %vm572_vm2 = vcmask 15360   ;;  %v504_v37 = vld [vmem:[%s3544_s3 + $0x18] sm:$0x3f] }
  0x4f   : > { %v539_v21 = vcombine.high %v519_v20, %v519_v20  ;;  %v502_v36 = vld [vmem:[%s3544_s3 + $0x8] sm:$0x3f]  ;;  %v501_v42 = vld [vmem:[%s3544_s3] sm:$0x3f]  ;;  %v503_v43 = vld [vmem:[%s3544_s3 + $0x10] sm:$0x3f] }
  0x50   : > { %v525_v15 = vunpack.c.0.s8 %v524_v13  ;;  %v3171_v16 = vshrl.u32 %v526_v14, 7  ;;  %v506_v47 = vld [vmem:[%s3544_s3 + $0x28] sm:$0x3f]  ;;  %v508_v48 = vld [vmem:[%s3544_s3 + $0x38] sm:$0x3f]  ;;  %vm884_vm3 = vcmask 48128  }
  0x51   : > { %v505_v53 = vld [vmem:[%s3544_s3 + $0x20] sm:$0x3f]  ;;  %v507_v54 = vld [vmem:[%s3544_s3 + $0x30] sm:$0x3f]  ;;  %vm2571_vm4 = vcmask 9216  }
  0x52   : > { %v528_v18 = vsub.s32 %v525_v15, %v3171_v16  ;;  %v500_v55 = vld [vmem:[%s3543_s2] sm:$0x3]  ;;  %v1315_v58 = vld [vmem:[#allocation4 + $0x1e8] sm:$0xff]  ;;  %v1314_v60 = vld [vmem:[#allocation4 + $0x1e0] sm:$0xff] }
  0x53   : > { %v495_v7 = vld [vmem:[#allocation3] sm:$0x3]  ;;  %v490_v8 = vld [vmem:[#allocation2] sm:$0x3f]  ;;  %v1443_v59 = vld [vmem:[#allocation4 + $0x5e8] sm:$0xff] }
  0x54   : > { %v497_v9 = vsel %vm496_vm0, %v495_v7, 0.0  ;;  %v492_v10 = vsel %vm491_vm1, %v490_v8, 0.0  ;;  %v529_v22 = vrot.slane %v518_v17, %v528_v18  ;;  %v536_v23 = vrot.slane %v522_v19, %v528_v18  ;;  %v1442_v61 = vld [vmem:[#allocation4 + $0x5e0] sm:$0xff]  ;;  %v1311_v62 = vld [vmem:[#allocation4 + $0x1c8] sm:$0xff] }
  0x55   : > { %498 = vadd.xlane.f32.xlu0 %v497_v9  ;;  %v546_v24 = vrot.slane %v519_v20, %v528_v18  ;;  %v553_v25 = vrot.slane %v539_v21, %v528_v18  ;;  %v1439_v63 = vld [vmem:[#allocation4 + $0x5c8] sm:$0xff]  ;;  %v1310_v0 = vld [vmem:[#allocation4 + $0x1c0] sm:$0xff] }
  0x56   : > { %v537_v26 = vcombine.high %v529_v22, %v529_v22  ;;  %v538_v27 = vcombine.high %v536_v23, %v536_v23  ;;  %v1438_v1 = vld [vmem:[#allocation4 + $0x5c0] sm:$0xff]  ;;  %v1307_v2 = vld [vmem:[#allocation4 + $0x1a8] sm:$0xff] }
  0x57   : > { %v554_v29 = vcombine.high %v546_v24, %v546_v24  ;;  %v555_v30 = vcombine.high %v553_v25, %v553_v25  ;;  %v1435_v3 = vld [vmem:[#allocation4 + $0x5a8] sm:$0xff]  ;;  %v1306_v4 = vld [vmem:[#allocation4 + $0x1a0] sm:$0xff] }
  0x58   : > { %v1434_v5 = vld [vmem:[#allocation4 + $0x5a0] sm:$0xff]  ;;  %v1303_v6 = vld [vmem:[#allocation4 + $0x188] sm:$0xff] }
  0x59   : > { %493 = vadd.xlane.f32.xlu0 %v492_v10  ;;  %v1431_v7 = vld [vmem:[#allocation4 + $0x588] sm:$0xff]  ;;  %v1302_v8 = vld [vmem:[#allocation4 + $0x180] sm:$0xff] }
  0x5a   : > { %v1430_v9 = vld [vmem:[#allocation4 + $0x580] sm:$0xff]  ;;  %v1299_v10 = vld [vmem:[#allocation4 + $0x168] sm:$0xff] }
  0x5b   : > { %v1298_v12 = vld [vmem:[#allocation4 + $0x160] sm:$0xff]  ;;  %v1295_v14 = vld [vmem:[#allocation4 + $0x148] sm:$0xff] }
  0x5c   : > { %v1426_v13 = vld [vmem:[#allocation4 + $0x560] sm:$0xff]  ;;  %v1423_v15 = vld [vmem:[#allocation4 + $0x548] sm:$0xff] }
  0x5d   : > { %v1294_v17 = vld [vmem:[#allocation4 + $0x140] sm:$0xff]  ;;  %v1291_v19 = vld [vmem:[#allocation4 + $0x128] sm:$0xff] }
  0x5e   : > { %v1422_v18 = vld [vmem:[#allocation4 + $0x540] sm:$0xff]  ;;  %v1419_v20 = vld [vmem:[#allocation4 + $0x528] sm:$0xff] }
  0x5f   : > { %v1290_v21 = vld [vmem:[#allocation4 + $0x120] sm:$0xff] }
  0xde   : > { %v499_v28 = vpop.xlane.xlu0 %498 }
  0xdf   : > { %v565_v31 = vmul.f32 %v537_v26, %v499_v28  ;;  %v567_v32 = vmul.f32 %v538_v27, %v499_v28  ;;  %v564_v33 = vmul.f32 %v529_v22, %v499_v28  ;;  %v566_v34 = vmul.f32 %v536_v23, %v499_v28  ;;  %v1418_v22 = vld [vmem:[#allocation4 + $0x520] sm:$0xff]  ;;  %v1287_v23 = vld [vmem:[#allocation4 + $0x108] sm:$0xff] }
  0xe0   : > { %v569_v38 = vmul.f32 %v554_v29, %v499_v28  ;;  %v571_v39 = vmul.f32 %v555_v30, %v499_v28  ;;  %v568_v41 = vmul.f32 %v546_v24, %v499_v28  ;;  %v570_v44 = vmul.f32 %v553_v25, %v499_v28  ;;  %v1415_v24 = vld [vmem:[#allocation4 + $0x508] sm:$0xff]  ;;  %v1286_v25 = vld [vmem:[#allocation4 + $0x100] sm:$0xff] }
  0xe1   : > { %2701 = vmatprep.subr.msk.mxu0 %vm496_vm0, %v565_v31  ;;  %2704 = vmatprep.subr.msk.mxu1 %vm496_vm0, %v567_v32  ;;  %v1414_v26 = vld [vmem:[#allocation4 + $0x500] sm:$0xff]  ;;  %v1283_v27 = vld [vmem:[#allocation4 + $0xe8] sm:$0xff] }
  0xe2   : > { %2702 = vmatpush1.msk.msra.mxu0 %vm496_vm0, %v564_v33  ;;  %2705 = vmatpush1.msk.msra.mxu1 %vm496_vm0, %v566_v34  ;;  %v494_v40 = vpop.xlane.xlu0 %493  ;;  %v1411_v28 = vld [vmem:[#allocation4 + $0x4e8] sm:$0xff]  ;;  %v1282_v29 = vld [vmem:[#allocation4 + $0xe0] sm:$0xff] }
  0xe3   : > { %2703 = vmatmul.mubr.msk.f32.vlgmr.msra.gmra.mxu0 %vm572_vm2, %v517_v35  ;;  %2706 = vmatmul.mubr.msk.f32.vlgmr.msra.gmra.mxu1 %vm572_vm2, %v517_v35  ;;  %v510_v45 = vmul.f32 %v502_v36, %v494_v40  ;;  %v512_v46 = vmul.f32 %v504_v37, %v494_v40  ;;  %v509_v49 = vmul.f32 %v501_v42, %v494_v40  ;;  %v1410_v30 = vld [vmem:[#allocation4 + $0x4e0] sm:$0xff]  ;;  %v1279_v31 = vld [vmem:[#allocation4 + $0xc8] sm:$0xff] }
  0xe4   : > { %2707 = vmatprep.subr.msk.mxu0 %vm496_vm0, %v569_v38  ;;  %2710 = vmatprep.subr.msk.mxu1 %vm496_vm0, %v571_v39  ;;  %v511_v50 = vmul.f32 %v503_v43, %v494_v40  ;;  %v514_v51 = vmul.f32 %v506_v47, %v494_v40  ;;  %v516_v52 = vmul.f32 %v508_v48, %v494_v40  ;;  %v1407_v32 = vld [vmem:[#allocation4 + $0x4c8] sm:$0xff]  ;;  %v1278_v33 = vld [vmem:[#allocation4 + $0xc0] sm:$0xff] }
  0xe5   : > { %2708 = vmatpush1.msk.msra.mxu0 %vm496_vm0, %v568_v41  ;;  %2711 = vmatpush1.msk.msra.mxu1 %vm496_vm0, %v570_v44  ;;  %v513_v56 = vmul.f32 %v505_v53, %v494_v40  ;;  %v515_v57 = vmul.f32 %v507_v54, %v494_v40  ;;  %v1406_v34 = vld [vmem:[#allocation4 + $0x4c0] sm:$0xff]  ;;  %v1403_v36 = vld [vmem:[#allocation4 + $0x4a8] sm:$0xff] }
  0xe6   : > { %806 = vmatprep.mubr.f32.mxu0 %v3013_v11  ;;  %877 = vmatprep.mubr.f32.mxu1 %v3013_v11  ;;  %v1274_v37 = vld [vmem:[#allocation4 + $0xa0] sm:$0xff]  ;;  %v1271_v39 = vld [vmem:[#allocation4 + $0x88] sm:$0xff] }
  0xe7   : > { %2713 = vmatprep.subr.msk.mxu0 %vm491_vm1, %v510_v45  ;;  %2716 = vmatprep.subr.msk.mxu1 %vm491_vm1, %v512_v46  ;;  %v1402_v38 = vld [vmem:[#allocation4 + $0x4a0] sm:$0xff]  ;;  %v1399_v40 = vld [vmem:[#allocation4 + $0x488] sm:$0xff] }
  0xe8   : > { %2709 = vmatmul.mubr.msk.f32.vlgmr.msra.gmra.mxu0 %vm572_vm2, %v517_v35  ;;  %2712 = vmatmul.mubr.msk.f32.vlgmr.msra.gmra.mxu1 %vm572_vm2, %v517_v35  ;;  %v1275_v35 = vld [vmem:[#allocation4 + $0xa8] sm:$0xff]  ;;  %v1270_v41 = vld [vmem:[#allocation4 + $0x80] sm:$0xff] }
  0xe9   : > { %2714 = vmatpush1.msk.msra.mxu0 %vm491_vm1, %v509_v49  ;;  %2717 = vmatpush1.msk.msra.mxu1 %vm491_vm1, %v511_v50  ;;  %v1398_v42 = vld [vmem:[#allocation4 + $0x480] sm:$0xff]  ;;  %v1267_v43 = vld [vmem:[#allocation4 + $0x68] sm:$0xff] }
  0xea   : > { %2719 = vmatprep.subr.msk.mxu0 %vm491_vm1, %v514_v51  ;;  %2722 = vmatprep.subr.msk.mxu1 %vm491_vm1, %v516_v52  ;;  %v1395_v44 = vld [vmem:[#allocation4 + $0x468] sm:$0xff]  ;;  %v1266_v45 = vld [vmem:[#allocation4 + $0x60] sm:$0xff] }
  0xeb   : > { %976 = vmatprep.mubr.f32.mxu0 %v3013_v11  ;;  %1047 = vmatprep.mubr.f32.mxu1 %v3013_v11  ;;  %v1394_v46 = vld [vmem:[#allocation4 + $0x460] sm:$0xff]  ;;  %v1263_v47 = vld [vmem:[#allocation4 + $0x48] sm:$0xff] }
  0xec   : > { %2715 = vmatmul.mubr.msk.f32.vlgmr.msra.gmra.mxu0 %vm884_vm3, %v500_v55  ;;  %2718 = vmatmul.mubr.msk.f32.vlgmr.msra.gmra.mxu1 %vm884_vm3, %v500_v55  ;;  %v1391_v48 = vld [vmem:[#allocation4 + $0x448] sm:$0xff]  ;;  %v1262_v49 = vld [vmem:[#allocation4 + $0x40] sm:$0xff] }
  0xed   : > { %2720 = vmatpush1.msk.msra.mxu0 %vm491_vm1, %v513_v56  ;;  %2723 = vmatpush1.msk.msra.mxu1 %vm491_vm1, %v515_v57  ;;  %v1390_v50 = vld [vmem:[#allocation4 + $0x440] sm:$0xff]  ;;  %v1259_v51 = vld [vmem:[#allocation4 + $0x28] sm:$0xff] }
  0xee   : > { %1118 = vmatprep.mubr.f32.mxu0 %v3013_v11  ;;  %1189 = vmatprep.mubr.f32.mxu1 %v3013_v11  ;;  %v1427_v11 = vld [vmem:[#allocation4 + $0x568] sm:$0xff]  ;;  %v1258_v53 = vld [vmem:[#allocation4 + $0x20] sm:$0xff] }
  0xef   : > { %1788 = vmatprep.subr.mxu0 %v1315_v58  ;;  %1859 = vmatprep.subr.mxu1 %v1443_v59  ;;  %v1387_v52 = vld [vmem:[#allocation4 + $0x428] sm:$0xff]  ;;  %v1386_v54 = vld [vmem:[#allocation4 + $0x420] sm:$0xff] }
  0xf0   : > { %2721 = vmatmul.mubr.msk.f32.vlgmr.msra.gmra.mxu0 %vm884_vm3, %v500_v55  ;;  %2724 = vmatmul.mubr.msk.f32.vlgmr.msra.gmra.mxu1 %vm884_vm3, %v500_v55  ;;  %v1255_v55 = vld [vmem:[#allocation4 + $0x8] sm:$0xff]  ;;  %v1254_v57 = vld [vmem:[#allocation4] sm:$0xff] }
  0xf1   : > { %1789 = vmatpush1.msra.mxu0 %v1314_v60  ;;  %1860 = vmatpush1.msra.mxu1 %v1442_v61  ;;  %v1383_v56 = vld [vmem:[#allocation4 + $0x408] sm:$0xff]  ;;  %v1382_v58 = vld [vmem:[#allocation4 + $0x400] sm:$0xff] }
  0xf2   : > { %1790 = vmatprep.subr.mxu0 %v1311_v62  ;;  %1861 = vmatprep.subr.mxu1 %v1439_v63  ;;  %v1379_v59 = vld [vmem:[#allocation4 + $0x3e8] sm:$0xff]  ;;  %v1378_v61 = vld [vmem:[#allocation4 + $0x3e0] sm:$0xff] }
  0xf3   : > { %1791 = vmatpush1.msra.mxu0 %v1310_v0  ;;  %1862 = vmatpush1.msra.mxu1 %v1438_v1  ;;  %v1507_v60 = vld [vmem:[#allocation4 + $0x7e8] sm:$0xff]  ;;  %v1506_v62 = vld [vmem:[#allocation4 + $0x7e0] sm:$0xff] }
  0xf4   : > { %1792 = vmatprep.subr.mxu0 %v1307_v2  ;;  %1863 = vmatprep.subr.mxu1 %v1435_v3  ;;  %v1375_v63 = vld [vmem:[#allocation4 + $0x3c8] sm:$0xff]  ;;  %v1374_v1 = vld [vmem:[#allocation4 + $0x3c0] sm:$0xff] }
  0xf5   : > { %1793 = vmatpush1.msra.mxu0 %v1306_v4  ;;  %1864 = vmatpush1.msra.mxu1 %v1434_v5  ;;  %v1503_v0 = vld [vmem:[#allocation4 + $0x7c8] sm:$0xff]  ;;  %v1502_v2 = vld [vmem:[#allocation4 + $0x7c0] sm:$0xff] }
  0xf6   : > { %1794 = vmatprep.subr.mxu0 %v1303_v6  ;;  %1865 = vmatprep.subr.mxu1 %v1431_v7  ;;  %v1371_v3 = vld [vmem:[#allocation4 + $0x3a8] sm:$0xff]  ;;  %v1370_v5 = vld [vmem:[#allocation4 + $0x3a0] sm:$0xff] }
  0xf7   : > { %1795 = vmatpush1.msra.mxu0 %v1302_v8  ;;  %1866 = vmatpush1.msra.mxu1 %v1430_v9  ;;  %v1499_v4 = vld [vmem:[#allocation4 + $0x7a8] sm:$0xff]  ;;  %v1498_v6 = vld [vmem:[#allocation4 + $0x7a0] sm:$0xff] }
  0xf8   : > { %1796 = vmatprep.subr.mxu0 %v1299_v10  ;;  %1867 = vmatprep.subr.mxu1 %v1427_v11  ;;  %v1367_v7 = vld [vmem:[#allocation4 + $0x388] sm:$0xff]  ;;  %v1366_v9 = vld [vmem:[#allocation4 + $0x380] sm:$0xff] }
  0xf9   : > { %1797 = vmatpush1.msra.mxu0 %v1298_v12  ;;  %1868 = vmatpush1.msra.mxu1 %v1426_v13  ;;  %v1495_v8 = vld [vmem:[#allocation4 + $0x788] sm:$0xff]  ;;  %v1494_v10 = vld [vmem:[#allocation4 + $0x780] sm:$0xff] }
  0xfa   : > { %1798 = vmatprep.subr.mxu0 %v1295_v14  ;;  %1869 = vmatprep.subr.mxu1 %v1423_v15  ;;  %v1363_v11 = vld [vmem:[#allocation4 + $0x368] sm:$0xff]  ;;  %v1362_v13 = vld [vmem:[#allocation4 + $0x360] sm:$0xff] }
  0xfb   : > { %1799 = vmatpush1.msra.mxu0 %v1294_v17  ;;  %1870 = vmatpush1.msra.mxu1 %v1422_v18  ;;  %v1491_v12 = vld [vmem:[#allocation4 + $0x768] sm:$0xff]  ;;  %v1490_v14 = vld [vmem:[#allocation4 + $0x760] sm:$0xff] }
  0xfc   : > { %1800 = vmatprep.subr.mxu0 %v1291_v19  ;;  %1871 = vmatprep.subr.mxu1 %v1419_v20  ;;  %v1359_v15 = vld [vmem:[#allocation4 + $0x348] sm:$0xff]  ;;  %v1358_v18 = vld [vmem:[#allocation4 + $0x340] sm:$0xff] }
  0xfd   : > { %1801 = vmatpush1.msra.mxu0 %v1290_v21  ;;  %1872 = vmatpush1.msra.mxu1 %v1418_v22  ;;  %v1487_v17 = vld [vmem:[#allocation4 + $0x748] sm:$0xff]  ;;  %v1486_v19 = vld [vmem:[#allocation4 + $0x740] sm:$0xff] }
  0xfe   : > { %1802 = vmatprep.subr.mxu0 %v1287_v23  ;;  %1873 = vmatprep.subr.mxu1 %v1415_v24  ;;  %v1355_v20 = vld [vmem:[#allocation4 + $0x328] sm:$0xff]  ;;  %v1354_v22 = vld [vmem:[#allocation4 + $0x320] sm:$0xff] }
  0xff   : > { %1803 = vmatpush1.msra.mxu0 %v1286_v25  ;;  %1874 = vmatpush1.msra.mxu1 %v1414_v26  ;;  %v1483_v21 = vld [vmem:[#allocation4 + $0x728] sm:$0xff]  ;;  %v1482_v23 = vld [vmem:[#allocation4 + $0x720] sm:$0xff] }
 0x100   : > { %1804 = vmatprep.subr.mxu0 %v1283_v27  ;;  %1875 = vmatprep.subr.mxu1 %v1411_v28  ;;  %v1351_v24 = vld [vmem:[#allocation4 + $0x308] sm:$0xff]  ;;  %v1350_v26 = vld [vmem:[#allocation4 + $0x300] sm:$0xff] }
 0x101   : > { %1805 = vmatpush1.msra.mxu0 %v1282_v29  ;;  %1876 = vmatpush1.msra.mxu1 %v1410_v30  ;;  %v1479_v25 = vld [vmem:[#allocation4 + $0x708] sm:$0xff]  ;;  %v1478_v27 = vld [vmem:[#allocation4 + $0x700] sm:$0xff] }
 0x102   : > { %1806 = vmatprep.subr.mxu0 %v1279_v31  ;;  %1877 = vmatprep.subr.mxu1 %v1407_v32  ;;  %v1347_v28 = vld [vmem:[#allocation4 + $0x2e8] sm:$0xff]  ;;  %v1346_v30 = vld [vmem:[#allocation4 + $0x2e0] sm:$0xff] }
 0x103   : > { %1807 = vmatpush1.msra.mxu0 %v1278_v33  ;;  %1878 = vmatpush1.msra.mxu1 %v1406_v34  ;;  %v1475_v29 = vld [vmem:[#allocation4 + $0x6e8] sm:$0xff]  ;;  %v1474_v31 = vld [vmem:[#allocation4 + $0x6e0] sm:$0xff] }
 0x104   : > { %1808 = vmatprep.subr.mxu0 %v1275_v35  ;;  %1879 = vmatprep.subr.mxu1 %v1403_v36  ;;  %v1343_v32 = vld [vmem:[#allocation4 + $0x2c8] sm:$0xff]  ;;  %v1342_v34 = vld [vmem:[#allocation4 + $0x2c0] sm:$0xff] }
 0x105   : > { %1809 = vmatpush1.msra.mxu0 %v1274_v37  ;;  %1880 = vmatpush1.msra.mxu1 %v1402_v38  ;;  %v1471_v33 = vld [vmem:[#allocation4 + $0x6c8] sm:$0xff]  ;;  %v1470_v35 = vld [vmem:[#allocation4 + $0x6c0] sm:$0xff] }
 0x106   : > { %1810 = vmatprep.subr.mxu0 %v1271_v39  ;;  %1881 = vmatprep.subr.mxu1 %v1399_v40  ;;  %v1339_v36 = vld [vmem:[#allocation4 + $0x2a8] sm:$0xff]  ;;  %v1338_v38 = vld [vmem:[#allocation4 + $0x2a0] sm:$0xff] }
 0x107   : > { %1811 = vmatpush1.msra.mxu0 %v1270_v41  ;;  %1882 = vmatpush1.msra.mxu1 %v1398_v42  ;;  %v1467_v37 = vld [vmem:[#allocation4 + $0x6a8] sm:$0xff]  ;;  %v1466_v39 = vld [vmem:[#allocation4 + $0x6a0] sm:$0xff] }
 0x108   : > { %1812 = vmatprep.subr.mxu0 %v1267_v43  ;;  %1883 = vmatprep.subr.mxu1 %v1395_v44  ;;  %v1335_v40 = vld [vmem:[#allocation4 + $0x288] sm:$0xff]  ;;  %v1334_v42 = vld [vmem:[#allocation4 + $0x280] sm:$0xff] }
 0x109   : > { %1813 = vmatpush1.msra.mxu0 %v1266_v45  ;;  %1884 = vmatpush1.msra.mxu1 %v1394_v46  ;;  %v1463_v41 = vld [vmem:[#allocation4 + $0x688] sm:$0xff]  ;;  %v1462_v43 = vld [vmem:[#allocation4 + $0x680] sm:$0xff] }
 0x10a   : > { %1814 = vmatprep.subr.mxu0 %v1263_v47  ;;  %1885 = vmatprep.subr.mxu1 %v1391_v48  ;;  %v1331_v44 = vld [vmem:[#allocation4 + $0x268] sm:$0xff]  ;;  %v1330_v46 = vld [vmem:[#allocation4 + $0x260] sm:$0xff] }
 0x10b   : > { %1815 = vmatpush1.msra.mxu0 %v1262_v49  ;;  %1886 = vmatpush1.msra.mxu1 %v1390_v50  ;;  %v1459_v45 = vld [vmem:[#allocation4 + $0x668] sm:$0xff]  ;;  %v1458_v47 = vld [vmem:[#allocation4 + $0x660] sm:$0xff] }
 0x10c   : > { %1816 = vmatprep.subr.mxu0 %v1259_v51  ;;  %1887 = vmatprep.subr.mxu1 %v1387_v52  ;;  %v1327_v48 = vld [vmem:[#allocation4 + $0x248] sm:$0xff]  ;;  %v1326_v50 = vld [vmem:[#allocation4 + $0x240] sm:$0xff] }
 0x10d   : > { %1817 = vmatpush1.msra.mxu0 %v1258_v53  ;;  %1888 = vmatpush1.msra.mxu1 %v1386_v54  ;;  %v1455_v49 = vld [vmem:[#allocation4 + $0x648] sm:$0xff]  ;;  %v1454_v51 = vld [vmem:[#allocation4 + $0x640] sm:$0xff] }
 0x10e   : > { %1818 = vmatprep.subr.mxu0 %v1255_v55  ;;  %1889 = vmatprep.subr.mxu1 %v1383_v56  ;;  %v1323_v52 = vld [vmem:[#allocation4 + $0x228] sm:$0xff]  ;;  %v1322_v54 = vld [vmem:[#allocation4 + $0x220] sm:$0xff] }
 0x10f   : > { %1819 = vmatpush1.msra.mxu0 %v1254_v57  ;;  %1890 = vmatpush1.msra.mxu1 %v1382_v58  ;;  %v1451_v53 = vld [vmem:[#allocation4 + $0x628] sm:$0xff]  ;;  %v1450_v55 = vld [vmem:[#allocation4 + $0x620] sm:$0xff] }
 0x110   : > { %1820 = vmatprep.subr.mxu0 %v1379_v59  ;;  %1891 = vmatprep.subr.mxu1 %v1507_v60  ;;  %v1319_v56 = vld [vmem:[#allocation4 + $0x208] sm:$0xff]  ;;  %v1318_v58 = vld [vmem:[#allocation4 + $0x200] sm:$0xff] }
 0x111   : > { %1821 = vmatpush2.msra.mxu0 %v1378_v61  ;;  %1892 = vmatpush2.msra.mxu1 %v1506_v62  ;;  %v1447_v57 = vld [vmem:[#allocation4 + $0x608] sm:$0xff]  ;;  %v1446_v59 = vld [vmem:[#allocation4 + $0x600] sm:$0xff] }
 0x112   : > { %1822 = vmatprep.subr.mxu0 %v1375_v63  ;;  %1893 = vmatprep.subr.mxu1 %v1503_v0  ;;  %v1571_v60 = vld [vmem:[#allocation4 + $0x9e8] sm:$0xff] }
 0x113   : > { %1823 = vmatpush2.msra.mxu0 %v1374_v1  ;;  %1894 = vmatpush2.msra.mxu1 %v1502_v2  ;;  %v1699_v61 = vld [vmem:[#allocation4 + $0xde8] sm:$0xff]  ;;  %v1200_v2 = vsub.s32 0, %v3171_v16 }
 0x114   : > { %1824 = vmatprep.subr.mxu0 %v1371_v3  ;;  %1895 = vmatprep.subr.mxu1 %v1499_v4  ;;  %v1208_v3 = vsub.s32 2, %v3171_v16 }
 0x115   : > { %1825 = vmatpush2.msra.mxu0 %v1370_v5  ;;  %1896 = vmatpush2.msra.mxu1 %v1498_v6  ;;  %v1196_v6 = vld [vmem:[%s3547_s6] sm:$0xff] }
 0x116   : > { %1826 = vmatprep.subr.mxu0 %v1367_v7  ;;  %1897 = vmatprep.subr.mxu1 %v1495_v8  ;;  %v1204_v7 = vsub.s32 1, %v3171_v16  ;;  %v1212_v8 = vsub.s32 3, %v3171_v16 }
 0x117   : > { %1827 = vmatpush2.msra.mxu0 %v1366_v9  ;;  %1898 = vmatpush2.msra.mxu1 %v1494_v10 }
 0x118   : > { %1828 = vmatprep.subr.mxu0 %v1363_v11  ;;  %1899 = vmatprep.subr.mxu1 %v1491_v12  ;;  %v1201_v11 = vrot.slane %v1196_v6, %v1200_v2  ;;  %v1209_v12 = vrot.slane %v1196_v6, %v1208_v3 }
 0x119   : > { %1829 = vmatpush2.msra.mxu0 %v1362_v13  ;;  %1900 = vmatpush2.msra.mxu1 %v1490_v14 }
 0x11a   : > { %1830 = vmatprep.subr.mxu0 %v1359_v15  ;;  %1901 = vmatprep.subr.mxu1 %v1487_v17  ;;  %v1205_v15 = vrot.slane %v1196_v6, %v1204_v7  ;;  %v1213_v17 = vrot.slane %v1196_v6, %v1212_v8 }
 0x11b   : > { %1831 = vmatpush2.msra.mxu0 %v1358_v18  ;;  %1902 = vmatpush2.msra.mxu1 %v1486_v19  ;;  %v1216_v18 = vsub.s32 4, %v3171_v16  ;;  %v1224_v19 = vsub.s32 6, %v3171_v16 }
 0x11c   : > { %1832 = vmatprep.subr.mxu0 %v1355_v20  ;;  %1903 = vmatprep.subr.mxu1 %v1483_v21 }
 0x11d   : > { %1833 = vmatpush2.msra.mxu0 %v1354_v22  ;;  %1904 = vmatpush2.msra.mxu1 %v1482_v23  ;;  %v1220_v22 = vsub.s32 5, %v3171_v16  ;;  %v1228_v23 = vsub.s32 7, %v3171_v16 }
 0x11e   : > { %1834 = vmatprep.subr.mxu0 %v1351_v24  ;;  %1905 = vmatprep.subr.mxu1 %v1479_v25 }
 0x11f   : > { %1835 = vmatpush2.msra.mxu0 %v1350_v26  ;;  %1906 = vmatpush2.msra.mxu1 %v1478_v27 }
 0x120   : > { %1836 = vmatprep.subr.mxu0 %v1347_v28  ;;  %1907 = vmatprep.subr.mxu1 %v1475_v29 }
 0x121   : > { %1837 = vmatpush2.msra.mxu0 %v1346_v30  ;;  %1908 = vmatpush2.msra.mxu1 %v1474_v31  ;;  %v1217_v31 = vrot.slane %v1196_v6, %v1216_v18  ;;  %v1675_v18 = vld [vmem:[#allocation4 + $0xd28] sm:$0xff] }
 0x122   : > { %1838 = vmatprep.subr.mxu0 %v1343_v32  ;;  %1909 = vmatprep.subr.mxu1 %v1471_v33  ;;  %v1225_v33 = vrot.slane %v1196_v6, %v1224_v19  ;;  %v1546_v19 = vld [vmem:[#allocation4 + $0x920] sm:$0xff] }
 0x123   : > { %1839 = vmatpush2.msra.mxu0 %v1342_v34  ;;  %1910 = vmatpush2.msra.mxu1 %v1470_v35 }
 0x124   : > { %1840 = vmatprep.subr.mxu0 %v1339_v36  ;;  %1911 = vmatprep.subr.mxu1 %v1467_v37  ;;  %v1221_v36 = vrot.slane %v1196_v6, %v1220_v22  ;;  %v1229_v37 = vrot.slane %v1196_v6, %v1228_v23  ;;  %v1555_v6 = vld [vmem:[#allocation4 + $0x968] sm:$0xff]  ;;  %v1542_v23 = vld [vmem:[#allocation4 + $0x900] sm:$0xff] }
 0x125   : > { %1841 = vmatpush2.msra.mxu0 %v1338_v38  ;;  %1912 = vmatpush2.msra.mxu1 %v1466_v39  ;;  %v1671_v22 = vld [vmem:[#allocation4 + $0xd08] sm:$0xff] }
 0x126   : > { %1842 = vmatprep.subr.mxu0 %v1335_v40  ;;  %1913 = vmatprep.subr.mxu1 %v1463_v41 }
 0x127   : > { %1843 = vmatpush2.msra.mxu0 %v1334_v42  ;;  %1914 = vmatpush2.msra.mxu1 %v1462_v43 }
 0x128   : > { %1844 = vmatprep.subr.mxu0 %v1331_v44  ;;  %1915 = vmatprep.subr.mxu1 %v1459_v45 }
 0x129   : > { %1845 = vmatpush2.msra.mxu0 %v1330_v46  ;;  %1916 = vmatpush2.msra.mxu1 %v1458_v47 }
 0x12a   : > { %1846 = vmatprep.subr.mxu0 %v1327_v48  ;;  %1917 = vmatprep.subr.mxu1 %v1455_v49 }
 0x12b   : > { %1847 = vmatpush2.msra.mxu0 %v1326_v50  ;;  %1918 = vmatpush2.msra.mxu1 %v1454_v51  ;;  %v1570_v50 = vld [vmem:[#allocation4 + $0x9e0] sm:$0xff] }
 0x12c   : > { %1848 = vmatprep.subr.mxu0 %v1323_v52  ;;  %1919 = vmatprep.subr.mxu1 %v1451_v53  ;;  %v1698_v51 = vld [vmem:[#allocation4 + $0xde0] sm:$0xff] }
 0x12d   : > { %1849 = vmatpush2.msra.mxu0 %v1322_v54  ;;  %1920 = vmatpush2.msra.mxu1 %v1450_v55  ;;  %v1567_v54 = vld [vmem:[#allocation4 + $0x9c8] sm:$0xff] }
 0x12e   : > { %1850 = vmatprep.subr.mxu0 %v1319_v56  ;;  %1921 = vmatprep.subr.mxu1 %v1447_v57  ;;  %v1695_v55 = vld [vmem:[#allocation4 + $0xdc8] sm:$0xff]  ;;  %v1566_v56 = vld [vmem:[#allocation4 + $0x9c0] sm:$0xff] }
 0x12f   : > { %1851 = vmatpush2.msra.mxu0 %v1318_v58  ;;  %1922 = vmatpush2.msra.mxu1 %v1446_v59  ;;  %v1694_v57 = vld [vmem:[#allocation4 + $0xdc0] sm:$0xff] }
 0x130   : > { %1930 = vmatprep.subr.mxu0 %v1571_v60  ;;  %2001 = vmatprep.subr.mxu1 %v1699_v61  ;;  %v1563_v60 = vld [vmem:[#allocation4 + $0x9a8] sm:$0xff] }
 0x131   : > { %v1691_v61 = vld [vmem:[#allocation4 + $0xda8] sm:$0xff] }
 0x1a3   : > { %v666_v62 = vpop.f32.mrf.mxu0  ;;  %v737_v63 = vpop.f32.mrf.mxu1 }
 0x1a5   : > { %v668_v0 = vpop.f32.mrf.mxu0  ;;  %v739_v1 = vpop.f32.mrf.mxu1 }
 0x1a8   : > { %v808_v4 = vpop.f32.mrf.mxu0  ;;  %v879_v5 = vpop.f32.mrf.mxu1 }
 0x1aa   : > { %v810_v9 = vpop.f32.mrf.mxu0  ;;  %v881_v10 = vpop.f32.mrf.mxu1 }
 0x1ac   : > { %v978_v13 = vpop.f32.mrf.mxu0  ;;  %v1049_v14 = vpop.f32.mrf.mxu1 }
 0x1ad   : > { %v979_v20 = vadd.f32 %v978_v13, %v666_v62  ;;  %v1050_v21 = vadd.f32 %v1049_v14, %v737_v63  ;;  %v1562_v62 = vld [vmem:[#allocation4 + $0x9a0] sm:$0xff]  ;;  %v1679_v13 = vld [vmem:[#allocation4 + $0xd48] sm:$0xff] }
 0x1ae   : > { %v980_v24 = vpop.f32.mrf.mxu0  ;;  %v1051_v25 = vpop.f32.mrf.mxu1  ;;  %v1690_v63 = vld [vmem:[#allocation4 + $0xda0] sm:$0xff] }
 0x1af   : > { %v981_v26 = vadd.f32 %v980_v24, %v668_v0  ;;  %v1052_v27 = vadd.f32 %v1051_v25, %v739_v1  ;;  %v3259_v28 = vadd.f32 %v1201_v11, %v979_v20  ;;  %v3261_v29 = vadd.f32 %v1209_v12, %v1050_v21  ;;  %v1559_v0 = vld [vmem:[#allocation4 + $0x988] sm:$0xff]  ;;  %v1682_v11 = vld [vmem:[#allocation4 + $0xd60] sm:$0xff] }
 0x1b0   : > { %v1120_v30 = vpop.f32.mrf.mxu0  ;;  %v1191_v32 = vpop.f32.mrf.mxu1  ;;  %v1687_v1 = vld [vmem:[#allocation4 + $0xd88] sm:$0xff]  ;;  %v1550_v14 = vld [vmem:[#allocation4 + $0x940] sm:$0xff] }
 0x1b1   : > { %v3263_v34 = vadd.f32 %v1205_v15, %v981_v26  ;;  %v3265_v35 = vadd.f32 %v1213_v17, %v1052_v27  ;;  %v1121_v38 = vadd.f32 %v1120_v30, %v808_v4  ;;  %v1192_v39 = vadd.f32 %v1191_v32, %v879_v5  ;;  %v1558_v4 = vld [vmem:[#allocation4 + $0x980] sm:$0xff]  ;;  %v1551_v12 = vld [vmem:[#allocation4 + $0x948] sm:$0xff] }
 0x1b2   : > { %v1122_v40 = vpop.f32.mrf.mxu0  ;;  %v1193_v41 = vpop.f32.mrf.mxu1  ;;  %v1246_v46 = vmax.f32 %v3259_v28, 0.0  ;;  %v1248_v47 = vmax.f32 %v3261_v29, 0.0  ;;  %v1686_v5 = vld [vmem:[#allocation4 + $0xd80] sm:$0xff]  ;;  %v1547_v17 = vld [vmem:[#allocation4 + $0x928] sm:$0xff]  ;;  %v1565_v28 = vld [vmem:[#allocation4 + $0x9b8] sm:$0xff] }
 0x1b3   : > { %v1247_v42 = vmax.f32 %v3263_v34, 0.0  ;;  %v1249_v43 = vmax.f32 %v3265_v35, 0.0  ;;  %v1123_v44 = vadd.f32 %v1122_v40, %v810_v9  ;;  %v1194_v45 = vadd.f32 %v1193_v41, %v881_v10  ;;  %v1683_v9 = vld [vmem:[#allocation4 + $0xd68] sm:$0xff]  ;;  %v1554_v10 = vld [vmem:[#allocation4 + $0x960] sm:$0xff]  ;;  %v1304_v34 = vld [vmem:[#allocation4 + $0x190] sm:$0xff] }
 0x1b4   : > { %v3271_v48 = vadd.f32 %v1217_v31, %v1121_v38  ;;  %v3273_v49 = vadd.f32 %v1225_v33, %v1192_v39  ;;  %v1678_v15 = vld [vmem:[#allocation4 + $0xd40] sm:$0xff]  ;;  %v1543_v21 = vld [vmem:[#allocation4 + $0x908] sm:$0xff]  ;;  %v1300_v35 = vld [vmem:[#allocation4 + $0x170] sm:$0xff] }
 0x1b5   : > { %v3275_v52 = vadd.f32 %v1221_v36, %v1123_v44  ;;  %v3277_v53 = vadd.f32 %v1229_v37, %v1194_v45  ;;  %1852 = vmatprep.mubr.f32.mxu0 %v1247_v42  ;;  %1923 = vmatprep.mubr.f32.mxu1 %v1249_v43  ;;  %v1674_v20 = vld [vmem:[#allocation4 + $0xd20] sm:$0xff]  ;;  %v1539_v25 = vld [vmem:[#allocation4 + $0x8e8] sm:$0xff]  ;;  %v1564_v29 = vld [vmem:[#allocation4 + $0x9b0] sm:$0xff] }
 0x1b6   : > { %1853 = vmatmul.mubr.f32.vlgmr.msra.gmra.mxu0 %v1246_v46  ;;  %1924 = vmatmul.mubr.f32.vlgmr.msra.gmra.mxu1 %v1248_v47  ;;  %v1670_v24 = vld [vmem:[#allocation4 + $0xd00] sm:$0xff]  ;;  %v1667_v26 = vld [vmem:[#allocation4 + $0xce8] sm:$0xff] }
 0x1b7   : > { %v1251_v58 = vmax.f32 %v3275_v52, 0.0  ;;  %v1253_v59 = vmax.f32 %v3277_v53, 0.0  ;;  %1931 = vmatpush1.msra.mxu0 %v1570_v50  ;;  %2002 = vmatpush1.msra.mxu1 %v1698_v51  ;;  %v1538_v27 = vld [vmem:[#allocation4 + $0x8e0] sm:$0xff]  ;;  %v1535_v31 = vld [vmem:[#allocation4 + $0x8c8] sm:$0xff]  ;;  %v1560_v52 = vld [vmem:[#allocation4 + $0x990] sm:$0xff] }
 0x1b8   : > { %1932 = vmatprep.subr.mxu0 %v1567_v54  ;;  %2003 = vmatprep.subr.mxu1 %v1695_v55  ;;  %v1666_v30 = vld [vmem:[#allocation4 + $0xce0] sm:$0xff]  ;;  %v1663_v32 = vld [vmem:[#allocation4 + $0xcc8] sm:$0xff]  ;;  %v1556_v53 = vld [vmem:[#allocation4 + $0x970] sm:$0xff] }
 0x1b9   : > { %1933 = vmatpush1.msra.mxu0 %v1566_v56  ;;  %2004 = vmatpush1.msra.mxu1 %v1694_v57  ;;  %v1534_v33 = vld [vmem:[#allocation4 + $0x8c0] sm:$0xff]  ;;  %v1531_v37 = vld [vmem:[#allocation4 + $0x8a8] sm:$0xff] }
 0x1ba   : > { %1934 = vmatprep.subr.mxu0 %v1563_v60  ;;  %1994 = vmatprep.mubr.f32.mxu0 %v1251_v58  ;;  %v1662_v36 = vld [vmem:[#allocation4 + $0xcc0] sm:$0xff]  ;;  %v1659_v38 = vld [vmem:[#allocation4 + $0xca8] sm:$0xff] }
 0x1bb   : > { %2005 = vmatprep.subr.mxu1 %v1691_v61  ;;  %2065 = vmatprep.mubr.f32.mxu1 %v1253_v59  ;;  %v1530_v39 = vld [vmem:[#allocation4 + $0x8a0] sm:$0xff]  ;;  %v1527_v41 = vld [vmem:[#allocation4 + $0x888] sm:$0xff] }
 0x1bc   : > { %1935 = vmatpush1.msra.mxu0 %v1562_v62  ;;  %2006 = vmatpush1.msra.mxu1 %v1690_v63  ;;  %v1658_v40 = vld [vmem:[#allocation4 + $0xca0] sm:$0xff]  ;;  %v1655_v44 = vld [vmem:[#allocation4 + $0xc88] sm:$0xff] }
 0x1bd   : > { %1936 = vmatprep.subr.mxu0 %v1559_v0  ;;  %2007 = vmatprep.subr.mxu1 %v1687_v1  ;;  %v1526_v45 = vld [vmem:[#allocation4 + $0x880] sm:$0xff]  ;;  %v1523_v51 = vld [vmem:[#allocation4 + $0x868] sm:$0xff] }
 0x1be   : > { %1937 = vmatpush1.msra.mxu0 %v1558_v4  ;;  %2008 = vmatpush1.msra.mxu1 %v1686_v5  ;;  %v1654_v50 = vld [vmem:[#allocation4 + $0xc80] sm:$0xff]  ;;  %v1651_v54 = vld [vmem:[#allocation4 + $0xc68] sm:$0xff] }
 0x1bf   : > { %1938 = vmatprep.subr.mxu0 %v1555_v6  ;;  %2009 = vmatprep.subr.mxu1 %v1683_v9  ;;  %v1522_v55 = vld [vmem:[#allocation4 + $0x860] sm:$0xff]  ;;  %v1519_v57 = vld [vmem:[#allocation4 + $0x848] sm:$0xff] }
 0x1c0   : > { %1939 = vmatpush1.msra.mxu0 %v1554_v10  ;;  %2010 = vmatpush1.msra.mxu1 %v1682_v11  ;;  %v1650_v56 = vld [vmem:[#allocation4 + $0xc60] sm:$0xff]  ;;  %v1647_v60 = vld [vmem:[#allocation4 + $0xc48] sm:$0xff] }
 0x1c1   : > { %1940 = vmatprep.subr.mxu0 %v1551_v12  ;;  %2011 = vmatprep.subr.mxu1 %v1679_v13  ;;  %v1518_v61 = vld [vmem:[#allocation4 + $0x840] sm:$0xff]  ;;  %v1515_v63 = vld [vmem:[#allocation4 + $0x828] sm:$0xff] }
 0x1c2   : > { %1941 = vmatpush1.msra.mxu0 %v1550_v14  ;;  %2012 = vmatpush1.msra.mxu1 %v1678_v15  ;;  %v1646_v62 = vld [vmem:[#allocation4 + $0xc40] sm:$0xff]  ;;  %v1643_v0 = vld [vmem:[#allocation4 + $0xc28] sm:$0xff] }
 0x1c3   : > { %1942 = vmatprep.subr.mxu0 %v1547_v17  ;;  %2013 = vmatprep.subr.mxu1 %v1675_v18  ;;  %v1514_v1 = vld [vmem:[#allocation4 + $0x820] sm:$0xff]  ;;  %v1511_v5 = vld [vmem:[#allocation4 + $0x808] sm:$0xff] }
 0x1c4   : > { %1943 = vmatpush1.msra.mxu0 %v1546_v19  ;;  %2014 = vmatpush1.msra.mxu1 %v1674_v20  ;;  %v1642_v4 = vld [vmem:[#allocation4 + $0xc20] sm:$0xff]  ;;  %v1639_v6 = vld [vmem:[#allocation4 + $0xc08] sm:$0xff] }
 0x1c5   : > { %1944 = vmatprep.subr.mxu0 %v1543_v21  ;;  %2015 = vmatprep.subr.mxu1 %v1671_v22  ;;  %v1510_v9 = vld [vmem:[#allocation4 + $0x800] sm:$0xff]  ;;  %v1635_v11 = vld [vmem:[#allocation4 + $0xbe8] sm:$0xff] }
 0x1c6   : > { %1945 = vmatpush1.msra.mxu0 %v1542_v23  ;;  %2016 = vmatpush1.msra.mxu1 %v1670_v24  ;;  %v1638_v10 = vld [vmem:[#allocation4 + $0xc00] sm:$0xff]  ;;  %v1763_v12 = vld [vmem:[#allocation4 + $0xfe8] sm:$0xff] }
 0x1c7   : > { %1946 = vmatprep.subr.mxu0 %v1539_v25  ;;  %2017 = vmatprep.subr.mxu1 %v1667_v26  ;;  %v1634_v13 = vld [vmem:[#allocation4 + $0xbe0] sm:$0xff]  ;;  %v1631_v15 = vld [vmem:[#allocation4 + $0xbc8] sm:$0xff] }
 0x1c8   : > { %1947 = vmatpush1.msra.mxu0 %v1538_v27  ;;  %2018 = vmatpush1.msra.mxu1 %v1666_v30  ;;  %v1762_v14 = vld [vmem:[#allocation4 + $0xfe0] sm:$0xff]  ;;  %v1759_v17 = vld [vmem:[#allocation4 + $0xfc8] sm:$0xff] }
 0x1c9   : > { %1948 = vmatprep.subr.mxu0 %v1535_v31  ;;  %2019 = vmatprep.subr.mxu1 %v1663_v32  ;;  %v1630_v18 = vld [vmem:[#allocation4 + $0xbc0] sm:$0xff]  ;;  %v1627_v20 = vld [vmem:[#allocation4 + $0xba8] sm:$0xff] }
 0x1ca   : > { %1949 = vmatpush1.msra.mxu0 %v1534_v33  ;;  %2020 = vmatpush1.msra.mxu1 %v1662_v36  ;;  %v1758_v19 = vld [vmem:[#allocation4 + $0xfc0] sm:$0xff]  ;;  %v1755_v21 = vld [vmem:[#allocation4 + $0xfa8] sm:$0xff] }
 0x1cb   : > { %1950 = vmatprep.subr.mxu0 %v1531_v37  ;;  %2021 = vmatprep.subr.mxu1 %v1659_v38  ;;  %v1626_v22 = vld [vmem:[#allocation4 + $0xba0] sm:$0xff]  ;;  %v1623_v24 = vld [vmem:[#allocation4 + $0xb88] sm:$0xff] }
 0x1cc   : > { %1951 = vmatpush1.msra.mxu0 %v1530_v39  ;;  %2022 = vmatpush1.msra.mxu1 %v1658_v40  ;;  %v1754_v23 = vld [vmem:[#allocation4 + $0xfa0] sm:$0xff]  ;;  %v1751_v25 = vld [vmem:[#allocation4 + $0xf88] sm:$0xff] }
 0x1cd   : > { %1952 = vmatprep.subr.mxu0 %v1527_v41  ;;  %2023 = vmatprep.subr.mxu1 %v1655_v44  ;;  %v1622_v26 = vld [vmem:[#allocation4 + $0xb80] sm:$0xff]  ;;  %v1619_v30 = vld [vmem:[#allocation4 + $0xb68] sm:$0xff] }
 0x1ce   : > { %1953 = vmatpush1.msra.mxu0 %v1526_v45  ;;  %2024 = vmatpush1.msra.mxu1 %v1654_v50  ;;  %v1750_v27 = vld [vmem:[#allocation4 + $0xf80] sm:$0xff]  ;;  %v1747_v31 = vld [vmem:[#allocation4 + $0xf68] sm:$0xff] }
 0x1cf   : > { %1954 = vmatprep.subr.mxu0 %v1523_v51  ;;  %2025 = vmatprep.subr.mxu1 %v1651_v54  ;;  %v1618_v32 = vld [vmem:[#allocation4 + $0xb60] sm:$0xff]  ;;  %v1615_v36 = vld [vmem:[#allocation4 + $0xb48] sm:$0xff] }
 0x1d0   : > { %1955 = vmatpush1.msra.mxu0 %v1522_v55  ;;  %2026 = vmatpush1.msra.mxu1 %v1650_v56  ;;  %v1746_v33 = vld [vmem:[#allocation4 + $0xf60] sm:$0xff]  ;;  %v1743_v37 = vld [vmem:[#allocation4 + $0xf48] sm:$0xff] }
 0x1d1   : > { %1956 = vmatprep.subr.mxu0 %v1519_v57  ;;  %2027 = vmatprep.subr.mxu1 %v1647_v60  ;;  %v1614_v38 = vld [vmem:[#allocation4 + $0xb40] sm:$0xff]  ;;  %v1611_v40 = vld [vmem:[#allocation4 + $0xb28] sm:$0xff] }
 0x1d2   : > { %1957 = vmatpush1.msra.mxu0 %v1518_v61  ;;  %2028 = vmatpush1.msra.mxu1 %v1646_v62  ;;  %v1742_v39 = vld [vmem:[#allocation4 + $0xf40] sm:$0xff]  ;;  %v1739_v41 = vld [vmem:[#allocation4 + $0xf28] sm:$0xff] }
 0x1d3   : > { %1958 = vmatprep.subr.mxu0 %v1515_v63  ;;  %2029 = vmatprep.subr.mxu1 %v1643_v0  ;;  %v1610_v44 = vld [vmem:[#allocation4 + $0xb20] sm:$0xff]  ;;  %v1607_v50 = vld [vmem:[#allocation4 + $0xb08] sm:$0xff] }
 0x1d4   : > { %1959 = vmatpush1.msra.mxu0 %v1514_v1  ;;  %2030 = vmatpush1.msra.mxu1 %v1642_v4  ;;  %v1738_v45 = vld [vmem:[#allocation4 + $0xf20] sm:$0xff]  ;;  %v1735_v51 = vld [vmem:[#allocation4 + $0xf08] sm:$0xff] }
 0x1d5   : > { %1960 = vmatprep.subr.mxu0 %v1511_v5  ;;  %2031 = vmatprep.subr.mxu1 %v1639_v6  ;;  %v1606_v54 = vld [vmem:[#allocation4 + $0xb00] sm:$0xff]  ;;  %v1603_v56 = vld [vmem:[#allocation4 + $0xae8] sm:$0xff] }
 0x1d6   : > { %1961 = vmatpush1.msra.mxu0 %v1510_v9  ;;  %2032 = vmatpush1.msra.mxu1 %v1638_v10  ;;  %v1734_v55 = vld [vmem:[#allocation4 + $0xf00] sm:$0xff]  ;;  %v1731_v57 = vld [vmem:[#allocation4 + $0xee8] sm:$0xff] }
 0x1d7   : > { %1962 = vmatprep.subr.mxu0 %v1635_v11  ;;  %2033 = vmatprep.subr.mxu1 %v1763_v12  ;;  %v1602_v60 = vld [vmem:[#allocation4 + $0xae0] sm:$0xff]  ;;  %v1599_v62 = vld [vmem:[#allocation4 + $0xac8] sm:$0xff] }
 0x1d8   : > { %1963 = vmatpush2.msra.mxu0 %v1634_v13  ;;  %2034 = vmatpush2.msra.mxu1 %v1762_v14  ;;  %v1730_v61 = vld [vmem:[#allocation4 + $0xee0] sm:$0xff]  ;;  %v1727_v63 = vld [vmem:[#allocation4 + $0xec8] sm:$0xff] }
 0x1d9   : > { %1964 = vmatprep.subr.mxu0 %v1631_v15  ;;  %2035 = vmatprep.subr.mxu1 %v1759_v17  ;;  %v1598_v0 = vld [vmem:[#allocation4 + $0xac0] sm:$0xff]  ;;  %v1595_v4 = vld [vmem:[#allocation4 + $0xaa8] sm:$0xff] }
 0x1da   : > { %1965 = vmatpush2.msra.mxu0 %v1630_v18  ;;  %2036 = vmatpush2.msra.mxu1 %v1758_v19  ;;  %v1726_v1 = vld [vmem:[#allocation4 + $0xec0] sm:$0xff]  ;;  %v1723_v5 = vld [vmem:[#allocation4 + $0xea8] sm:$0xff] }
 0x1db   : > { %1966 = vmatprep.subr.mxu0 %v1627_v20  ;;  %2037 = vmatprep.subr.mxu1 %v1755_v21  ;;  %v1594_v6 = vld [vmem:[#allocation4 + $0xaa0] sm:$0xff]  ;;  %v1591_v10 = vld [vmem:[#allocation4 + $0xa88] sm:$0xff] }
 0x1dc   : > { %1967 = vmatpush2.msra.mxu0 %v1626_v22  ;;  %2038 = vmatpush2.msra.mxu1 %v1754_v23  ;;  %v1722_v9 = vld [vmem:[#allocation4 + $0xea0] sm:$0xff]  ;;  %v1719_v11 = vld [vmem:[#allocation4 + $0xe88] sm:$0xff] }
 0x1dd   : > { %1968 = vmatprep.subr.mxu0 %v1623_v24  ;;  %2039 = vmatprep.subr.mxu1 %v1751_v25  ;;  %v1590_v12 = vld [vmem:[#allocation4 + $0xa80] sm:$0xff]  ;;  %v1587_v14 = vld [vmem:[#allocation4 + $0xa68] sm:$0xff] }
 0x1de   : > { %1969 = vmatpush2.msra.mxu0 %v1622_v26  ;;  %2040 = vmatpush2.msra.mxu1 %v1750_v27  ;;  %v1718_v13 = vld [vmem:[#allocation4 + $0xe80] sm:$0xff]  ;;  %v1715_v15 = vld [vmem:[#allocation4 + $0xe68] sm:$0xff] }
 0x1df   : > { %1970 = vmatprep.subr.mxu0 %v1619_v30  ;;  %2041 = vmatprep.subr.mxu1 %v1747_v31  ;;  %v1586_v17 = vld [vmem:[#allocation4 + $0xa60] sm:$0xff]  ;;  %v1583_v19 = vld [vmem:[#allocation4 + $0xa48] sm:$0xff] }
 0x1e0   : > { %1971 = vmatpush2.msra.mxu0 %v1618_v32  ;;  %2042 = vmatpush2.msra.mxu1 %v1746_v33  ;;  %v1714_v18 = vld [vmem:[#allocation4 + $0xe60] sm:$0xff]  ;;  %v1711_v20 = vld [vmem:[#allocation4 + $0xe48] sm:$0xff]  ;;  %v1250_v33 = vmax.f32 %v3271_v48, 0.0 }
 0x1e1   : > { %1972 = vmatprep.subr.mxu0 %v1615_v36  ;;  %2043 = vmatprep.subr.mxu1 %v1743_v37  ;;  %v1582_v21 = vld [vmem:[#allocation4 + $0xa40] sm:$0xff]  ;;  %v1579_v23 = vld [vmem:[#allocation4 + $0xa28] sm:$0xff]  ;;  %v1252_v36 = vmax.f32 %v3273_v49, 0.0  ;;  %v1317_v37 = vld [vmem:[#allocation4 + $0x1f8] sm:$0xff] }
 0x1e2   : > { %1973 = vmatpush2.msra.mxu0 %v1614_v38  ;;  %2044 = vmatpush2.msra.mxu1 %v1742_v39  ;;  %v1710_v22 = vld [vmem:[#allocation4 + $0xe40] sm:$0xff]  ;;  %v1707_v24 = vld [vmem:[#allocation4 + $0xe28] sm:$0xff]  ;;  %v1445_v38 = vld [vmem:[#allocation4 + $0x5f8] sm:$0xff] }
 0x1e3   : > { %1974 = vmatprep.subr.mxu0 %v1611_v40  ;;  %2045 = vmatprep.subr.mxu1 %v1739_v41  ;;  %v1578_v25 = vld [vmem:[#allocation4 + $0xa20] sm:$0xff]  ;;  %v1575_v27 = vld [vmem:[#allocation4 + $0xa08] sm:$0xff]  ;;  %v1316_v39 = vld [vmem:[#allocation4 + $0x1f0] sm:$0xff] }
 0x1e4   : > { %1975 = vmatpush2.msra.mxu0 %v1610_v44  ;;  %2046 = vmatpush2.msra.mxu1 %v1738_v45  ;;  %v1706_v26 = vld [vmem:[#allocation4 + $0xe20] sm:$0xff]  ;;  %v1703_v30 = vld [vmem:[#allocation4 + $0xe08] sm:$0xff]  ;;  %v1444_v40 = vld [vmem:[#allocation4 + $0x5f0] sm:$0xff] }
 0x1e5   : > { %1976 = vmatprep.subr.mxu0 %v1607_v50  ;;  %2047 = vmatprep.subr.mxu1 %v1735_v51  ;;  %v1574_v31 = vld [vmem:[#allocation4 + $0xa00] sm:$0xff]  ;;  %v1313_v41 = vld [vmem:[#allocation4 + $0x1d8] sm:$0xff]  ;;  %v1312_v45 = vld [vmem:[#allocation4 + $0x1d0] sm:$0xff] }
 0x1e6   : > { %1977 = vmatpush2.msra.mxu0 %v1606_v54  ;;  %2048 = vmatpush2.msra.mxu1 %v1734_v55  ;;  %v1702_v32 = vld [vmem:[#allocation4 + $0xe00] sm:$0xff]  ;;  %v1441_v44 = vld [vmem:[#allocation4 + $0x5d8] sm:$0xff]  ;;  %v1440_v50 = vld [vmem:[#allocation4 + $0x5d0] sm:$0xff] }
 0x1e7   : > { %1978 = vmatprep.subr.mxu0 %v1603_v56  ;;  %2049 = vmatprep.subr.mxu1 %v1731_v57  ;;  %v1309_v51 = vld [vmem:[#allocation4 + $0x1b8] sm:$0xff]  ;;  %v1308_v55 = vld [vmem:[#allocation4 + $0x1b0] sm:$0xff] }
 0x1e8   : > { %1979 = vmatpush2.msra.mxu0 %v1602_v60  ;;  %2050 = vmatpush2.msra.mxu1 %v1730_v61  ;;  %v1437_v54 = vld [vmem:[#allocation4 + $0x5b8] sm:$0xff]  ;;  %v1436_v56 = vld [vmem:[#allocation4 + $0x5b0] sm:$0xff] }
 0x1e9   : > { %1980 = vmatprep.subr.mxu0 %v1599_v62  ;;  %2051 = vmatprep.subr.mxu1 %v1727_v63  ;;  %v1305_v57 = vld [vmem:[#allocation4 + $0x198] sm:$0xff]  ;;  %v2423_v49 = vld [vmem:[%s3550_s9 + $0x1f8] sm:$0xff] }
 0x1ea   : > { %1981 = vmatpush2.msra.mxu0 %v1598_v0  ;;  %2052 = vmatpush2.msra.mxu1 %v1726_v1  ;;  %v1433_v60 = vld [vmem:[#allocation4 + $0x598] sm:$0xff]  ;;  %v1296_v1 = vld [vmem:[#allocation4 + $0x150] sm:$0xff] }
 0x1eb   : > { %1982 = vmatprep.subr.mxu0 %v1595_v4  ;;  %2053 = vmatprep.subr.mxu1 %v1723_v5  ;;  %v1301_v61 = vld [vmem:[#allocation4 + $0x178] sm:$0xff]  ;;  %v1424_v4 = vld [vmem:[#allocation4 + $0x550] sm:$0xff] }
 0x1ec   : > { %1983 = vmatpush2.msra.mxu0 %v1594_v6  ;;  %2054 = vmatpush2.msra.mxu1 %v1722_v9  ;;  %v1429_v62 = vld [vmem:[#allocation4 + $0x578] sm:$0xff]  ;;  %v1292_v9 = vld [vmem:[#allocation4 + $0x130] sm:$0xff] }
 0x1ed   : > { %1984 = vmatprep.subr.mxu0 %v1591_v10  ;;  %2055 = vmatprep.subr.mxu1 %v1719_v11  ;;  %v1297_v63 = vld [vmem:[#allocation4 + $0x158] sm:$0xff]  ;;  %v1420_v10 = vld [vmem:[#allocation4 + $0x530] sm:$0xff] }
 0x1ee   : > { %1985 = vmatpush2.msra.mxu0 %v1590_v12  ;;  %2056 = vmatpush2.msra.mxu1 %v1718_v13  ;;  %v1425_v0 = vld [vmem:[#allocation4 + $0x558] sm:$0xff]  ;;  %v1288_v13 = vld [vmem:[#allocation4 + $0x110] sm:$0xff] }
 0x1ef   : > { %1986 = vmatprep.subr.mxu0 %v1587_v14  ;;  %2057 = vmatprep.subr.mxu1 %v1715_v15  ;;  %v1293_v5 = vld [vmem:[#allocation4 + $0x138] sm:$0xff]  ;;  %v1416_v14 = vld [vmem:[#allocation4 + $0x510] sm:$0xff] }
 0x1f0   : > { %1987 = vmatpush2.msra.mxu0 %v1586_v17  ;;  %2058 = vmatpush2.msra.mxu1 %v1714_v18  ;;  %v1421_v6 = vld [vmem:[#allocation4 + $0x538] sm:$0xff]  ;;  %v1284_v18 = vld [vmem:[#allocation4 + $0xf0] sm:$0xff] }
 0x1f1   : > { %1988 = vmatprep.subr.mxu0 %v1583_v19  ;;  %2059 = vmatprep.subr.mxu1 %v1711_v20  ;;  %v1289_v11 = vld [vmem:[#allocation4 + $0x118] sm:$0xff]  ;;  %v1412_v19 = vld [vmem:[#allocation4 + $0x4f0] sm:$0xff] }
 0x1f2   : > { %1989 = vmatpush2.msra.mxu0 %v1582_v21  ;;  %2060 = vmatpush2.msra.mxu1 %v1710_v22  ;;  %v1417_v12 = vld [vmem:[#allocation4 + $0x518] sm:$0xff]  ;;  %v1280_v22 = vld [vmem:[#allocation4 + $0xd0] sm:$0xff] }
 0x1f3   : > { %1990 = vmatprep.subr.mxu0 %v1579_v23  ;;  %2061 = vmatprep.subr.mxu1 %v1707_v24  ;;  %v1285_v15 = vld [vmem:[#allocation4 + $0xf8] sm:$0xff]  ;;  %v1408_v23 = vld [vmem:[#allocation4 + $0x4d0] sm:$0xff] }
 0x1f4   : > { %1991 = vmatpush2.msra.mxu0 %v1578_v25  ;;  %2062 = vmatpush2.msra.mxu1 %v1706_v26  ;;  %v1413_v17 = vld [vmem:[#allocation4 + $0x4f8] sm:$0xff]  ;;  %v1276_v26 = vld [vmem:[#allocation4 + $0xb0] sm:$0xff] }
 0x1f5   : > { %1992 = vmatprep.subr.mxu0 %v1575_v27  ;;  %2063 = vmatprep.subr.mxu1 %v1703_v30  ;;  %v1281_v20 = vld [vmem:[#allocation4 + $0xd8] sm:$0xff]  ;;  %v1404_v27 = vld [vmem:[#allocation4 + $0x4b0] sm:$0xff] }
 0x1f6   : > { %1993 = vmatpush2.msra.mxu0 %v1574_v31  ;;  %2064 = vmatpush2.msra.mxu1 %v1702_v32  ;;  %v1409_v21 = vld [vmem:[#allocation4 + $0x4d8] sm:$0xff]  ;;  %v1272_v32 = vld [vmem:[#allocation4 + $0x90] sm:$0xff] }
 0x1f7   : > { %1995 = vmatmul.mubr.f32.vlgmr.msra.gmra.mxu0 %v1250_v33  ;;  %2066 = vmatmul.mubr.f32.vlgmr.msra.gmra.mxu1 %v1252_v36  ;;  %v1277_v24 = vld [vmem:[#allocation4 + $0xb8] sm:$0xff] }
 0x1f8   : > { %2072 = vmatprep.subr.mxu0 %v1317_v37  ;;  %2143 = vmatprep.subr.mxu1 %v1445_v38  ;;  %v1405_v25 = vld [vmem:[#allocation4 + $0x4b8] sm:$0xff]  ;;  %v1400_v37 = vld [vmem:[#allocation4 + $0x490] sm:$0xff] }
 0x1f9   : > { %2073 = vmatpush1.msra.mxu0 %v1316_v39  ;;  %2136 = vmatprep.mubr.f32.mxu0 %v1247_v42  ;;  %v1432_v42 = vld [vmem:[#allocation4 + $0x590] sm:$0xff]  ;;  %v1273_v30 = vld [vmem:[#allocation4 + $0x98] sm:$0xff] }
 0x1fa   : > { %2144 = vmatpush1.msra.mxu1 %v1444_v40  ;;  %2207 = vmatprep.mubr.f32.mxu1 %v1249_v43  ;;  %v1428_v43 = vld [vmem:[#allocation4 + $0x570] sm:$0xff]  ;;  %v1401_v31 = vld [vmem:[#allocation4 + $0x498] sm:$0xff] }
 0x1fb   : > { %2074 = vmatprep.subr.mxu0 %v1313_v41  ;;  %2145 = vmatprep.subr.mxu1 %v1441_v44  ;;  %v1269_v38 = vld [vmem:[#allocation4 + $0x78] sm:$0xff]  ;;  %v1268_v40 = vld [vmem:[#allocation4 + $0x70] sm:$0xff] }
 0x1fc   : > { %2075 = vmatpush1.msra.mxu0 %v1312_v45  ;;  %2146 = vmatpush1.msra.mxu1 %v1440_v50  ;;  %v1397_v39 = vld [vmem:[#allocation4 + $0x478] sm:$0xff]  ;;  %v1396_v41 = vld [vmem:[#allocation4 + $0x470] sm:$0xff] }
 0x1fd   : > { %2076 = vmatprep.subr.mxu0 %v1309_v51  ;;  %2147 = vmatprep.subr.mxu1 %v1437_v54  ;;  %v1265_v44 = vld [vmem:[#allocation4 + $0x58] sm:$0xff]  ;;  %v1264_v50 = vld [vmem:[#allocation4 + $0x50] sm:$0xff] }
 0x1fe   : > { %2077 = vmatpush1.msra.mxu0 %v1308_v55  ;;  %2148 = vmatpush1.msra.mxu1 %v1436_v56  ;;  %v1393_v45 = vld [vmem:[#allocation4 + $0x458] sm:$0xff]  ;;  %v1392_v51 = vld [vmem:[#allocation4 + $0x450] sm:$0xff] }
 0x1ff   : > { %2078 = vmatprep.subr.mxu0 %v1305_v57  ;;  %2149 = vmatprep.subr.mxu1 %v1433_v60  ;;  %v1261_v54 = vld [vmem:[#allocation4 + $0x38] sm:$0xff]  ;;  %v1260_v56 = vld [vmem:[#allocation4 + $0x30] sm:$0xff] }
 0x200   : > { %2079 = vmatpush1.msra.mxu0 %v1304_v34  ;;  %2150 = vmatpush1.msra.mxu1 %v1432_v42  ;;  %v1389_v55 = vld [vmem:[#allocation4 + $0x438] sm:$0xff]  ;;  %v1388_v57 = vld [vmem:[#allocation4 + $0x430] sm:$0xff] }
 0x201   : > { %2080 = vmatprep.subr.mxu0 %v1301_v61  ;;  %2151 = vmatprep.subr.mxu1 %v1429_v62  ;;  %v1257_v60 = vld [vmem:[#allocation4 + $0x18] sm:$0xff]  ;;  %v1256_v42 = vld [vmem:[#allocation4 + $0x10] sm:$0xff] }
 0x202   : > { %2081 = vmatpush1.msra.mxu0 %v1300_v35  ;;  %2152 = vmatpush1.msra.mxu1 %v1428_v43  ;;  %v1385_v34 = vld [vmem:[#allocation4 + $0x418] sm:$0xff]  ;;  %v1384_v61 = vld [vmem:[#allocation4 + $0x410] sm:$0xff] }
 0x203   : > { %2082 = vmatprep.subr.mxu0 %v1297_v63  ;;  %2153 = vmatprep.subr.mxu1 %v1425_v0  ;;  %v1381_v62 = vld [vmem:[#allocation4 + $0x3f8] sm:$0xff]  ;;  %v1380_v43 = vld [vmem:[#allocation4 + $0x3f0] sm:$0xff] }
 0x204   : > { %2083 = vmatpush1.msra.mxu0 %v1296_v1  ;;  %2154 = vmatpush1.msra.mxu1 %v1424_v4  ;;  %v1509_v35 = vld [vmem:[#allocation4 + $0x7f8] sm:$0xff]  ;;  %v1508_v63 = vld [vmem:[#allocation4 + $0x7f0] sm:$0xff] }
 0x205   : > { %2084 = vmatprep.subr.mxu0 %v1293_v5  ;;  %2155 = vmatprep.subr.mxu1 %v1421_v6  ;;  %v1377_v0 = vld [vmem:[#allocation4 + $0x3d8] sm:$0xff]  ;;  %v1376_v4 = vld [vmem:[#allocation4 + $0x3d0] sm:$0xff] }
 0x206   : > { %2085 = vmatpush1.msra.mxu0 %v1292_v9  ;;  %2156 = vmatpush1.msra.mxu1 %v1420_v10  ;;  %v1505_v1 = vld [vmem:[#allocation4 + $0x7d8] sm:$0xff]  ;;  %v1504_v5 = vld [vmem:[#allocation4 + $0x7d0] sm:$0xff] }
 0x207   : > { %2086 = vmatprep.subr.mxu0 %v1289_v11  ;;  %2157 = vmatprep.subr.mxu1 %v1417_v12  ;;  %v1373_v6 = vld [vmem:[#allocation4 + $0x3b8] sm:$0xff]  ;;  %v1372_v10 = vld [vmem:[#allocation4 + $0x3b0] sm:$0xff] }
 0x208   : > { %2087 = vmatpush1.msra.mxu0 %v1288_v13  ;;  %2158 = vmatpush1.msra.mxu1 %v1416_v14  ;;  %v1501_v9 = vld [vmem:[#allocation4 + $0x7b8] sm:$0xff]  ;;  %v1500_v11 = vld [vmem:[#allocation4 + $0x7b0] sm:$0xff] }
 0x209   : > { %2088 = vmatprep.subr.mxu0 %v1285_v15  ;;  %2159 = vmatprep.subr.mxu1 %v1413_v17  ;;  %v1369_v12 = vld [vmem:[#allocation4 + $0x398] sm:$0xff]  ;;  %v1368_v14 = vld [vmem:[#allocation4 + $0x390] sm:$0xff] }
 0x20a   : > { %2089 = vmatpush1.msra.mxu0 %v1284_v18  ;;  %2160 = vmatpush1.msra.mxu1 %v1412_v19  ;;  %v1497_v13 = vld [vmem:[#allocation4 + $0x798] sm:$0xff]  ;;  %v1496_v15 = vld [vmem:[#allocation4 + $0x790] sm:$0xff] }
 0x20b   : > { %2090 = vmatprep.subr.mxu0 %v1281_v20  ;;  %2161 = vmatprep.subr.mxu1 %v1409_v21  ;;  %v1365_v17 = vld [vmem:[#allocation4 + $0x378] sm:$0xff]  ;;  %v1364_v19 = vld [vmem:[#allocation4 + $0x370] sm:$0xff] }
 0x20c   : > { %2091 = vmatpush1.msra.mxu0 %v1280_v22  ;;  %2162 = vmatpush1.msra.mxu1 %v1408_v23  ;;  %v1493_v18 = vld [vmem:[#allocation4 + $0x778] sm:$0xff]  ;;  %v1492_v20 = vld [vmem:[#allocation4 + $0x770] sm:$0xff] }
 0x20d   : > { %2092 = vmatprep.subr.mxu0 %v1277_v24  ;;  %2163 = vmatprep.subr.mxu1 %v1405_v25  ;;  %v1361_v21 = vld [vmem:[#allocation4 + $0x358] sm:$0xff]  ;;  %v1360_v23 = vld [vmem:[#allocation4 + $0x350] sm:$0xff] }
 0x20e   : > { %2093 = vmatpush1.msra.mxu0 %v1276_v26  ;;  %2164 = vmatpush1.msra.mxu1 %v1404_v27  ;;  %v1489_v22 = vld [vmem:[#allocation4 + $0x758] sm:$0xff]  ;;  %v1488_v24 = vld [vmem:[#allocation4 + $0x750] sm:$0xff] }
 0x20f   : > { %2094 = vmatprep.subr.mxu0 %v1273_v30  ;;  %2165 = vmatprep.subr.mxu1 %v1401_v31  ;;  %v1357_v25 = vld [vmem:[#allocation4 + $0x338] sm:$0xff]  ;;  %v1356_v27 = vld [vmem:[#allocation4 + $0x330] sm:$0xff] }
 0x210   : > { %2095 = vmatpush1.msra.mxu0 %v1272_v32  ;;  %2166 = vmatpush1.msra.mxu1 %v1400_v37  ;;  %v1485_v26 = vld [vmem:[#allocation4 + $0x738] sm:$0xff]  ;;  %v1484_v30 = vld [vmem:[#allocation4 + $0x730] sm:$0xff] }
 0x211   : > { %2096 = vmatprep.subr.mxu0 %v1269_v38  ;;  %2167 = vmatprep.subr.mxu1 %v1397_v39  ;;  %v1353_v31 = vld [vmem:[#allocation4 + $0x318] sm:$0xff]  ;;  %v1352_v37 = vld [vmem:[#allocation4 + $0x310] sm:$0xff] }
 0x212   : > { %2097 = vmatpush1.msra.mxu0 %v1268_v40  ;;  %2168 = vmatpush1.msra.mxu1 %v1396_v41  ;;  %v1481_v32 = vld [vmem:[#allocation4 + $0x718] sm:$0xff]  ;;  %v1480_v38 = vld [vmem:[#allocation4 + $0x710] sm:$0xff] }
 0x213   : > { %2098 = vmatprep.subr.mxu0 %v1265_v44  ;;  %2169 = vmatprep.subr.mxu1 %v1393_v45  ;;  %v1349_v39 = vld [vmem:[#allocation4 + $0x2f8] sm:$0xff]  ;;  %v1348_v41 = vld [vmem:[#allocation4 + $0x2f0] sm:$0xff] }
 0x214   : > { %2099 = vmatpush1.msra.mxu0 %v1264_v50  ;;  %2170 = vmatpush1.msra.mxu1 %v1392_v51  ;;  %v1477_v40 = vld [vmem:[#allocation4 + $0x6f8] sm:$0xff]  ;;  %v1476_v44 = vld [vmem:[#allocation4 + $0x6f0] sm:$0xff] }
 0x215   : > { %2100 = vmatprep.subr.mxu0 %v1261_v54  ;;  %2171 = vmatprep.subr.mxu1 %v1389_v55  ;;  %v1345_v45 = vld [vmem:[#allocation4 + $0x2d8] sm:$0xff]  ;;  %v1344_v51 = vld [vmem:[#allocation4 + $0x2d0] sm:$0xff] }
 0x216   : > { %2101 = vmatpush1.msra.mxu0 %v1260_v56  ;;  %2172 = vmatpush1.msra.mxu1 %v1388_v57  ;;  %v1473_v50 = vld [vmem:[#allocation4 + $0x6d8] sm:$0xff]  ;;  %v1472_v54 = vld [vmem:[#allocation4 + $0x6d0] sm:$0xff] }
 0x217   : > { %2102 = vmatprep.subr.mxu0 %v1257_v60  ;;  %2173 = vmatprep.subr.mxu1 %v1385_v34  ;;  %v1341_v55 = vld [vmem:[#allocation4 + $0x2b8] sm:$0xff]  ;;  %v1340_v57 = vld [vmem:[#allocation4 + $0x2b0] sm:$0xff] }
 0x218   : > { %2103 = vmatpush1.msra.mxu0 %v1256_v42  ;;  %2174 = vmatpush1.msra.mxu1 %v1384_v61  ;;  %v1469_v56 = vld [vmem:[#allocation4 + $0x6b8] sm:$0xff]  ;;  %v1468_v60 = vld [vmem:[#allocation4 + $0x6b0] sm:$0xff] }
 0x219   : > { %2104 = vmatprep.subr.mxu0 %v1381_v62  ;;  %2175 = vmatprep.subr.mxu1 %v1509_v35  ;;  %v1337_v34 = vld [vmem:[#allocation4 + $0x298] sm:$0xff]  ;;  %v1336_v61 = vld [vmem:[#allocation4 + $0x290] sm:$0xff] }
 0x21a   : > { %2105 = vmatpush2.msra.mxu0 %v1380_v43  ;;  %2176 = vmatpush2.msra.mxu1 %v1508_v63  ;;  %v1465_v42 = vld [vmem:[#allocation4 + $0x698] sm:$0xff]  ;;  %v1464_v62 = vld [vmem:[#allocation4 + $0x690] sm:$0xff] }
 0x21b   : > { %2106 = vmatprep.subr.mxu0 %v1377_v0  ;;  %2177 = vmatprep.subr.mxu1 %v1505_v1  ;;  %v1333_v35 = vld [vmem:[#allocation4 + $0x278] sm:$0xff]  ;;  %v1332_v63 = vld [vmem:[#allocation4 + $0x270] sm:$0xff] }
 0x21c   : > { %2107 = vmatpush2.msra.mxu0 %v1376_v4  ;;  %2178 = vmatpush2.msra.mxu1 %v1504_v5  ;;  %v1461_v43 = vld [vmem:[#allocation4 + $0x678] sm:$0xff]  ;;  %v1460_v0 = vld [vmem:[#allocation4 + $0x670] sm:$0xff] }
 0x21d   : > { %2108 = vmatprep.subr.mxu0 %v1373_v6  ;;  %2179 = vmatprep.subr.mxu1 %v1501_v9  ;;  %v1329_v1 = vld [vmem:[#allocation4 + $0x258] sm:$0xff]  ;;  %v1328_v5 = vld [vmem:[#allocation4 + $0x250] sm:$0xff] }
 0x21e   : > { %2109 = vmatpush2.msra.mxu0 %v1372_v10  ;;  %2180 = vmatpush2.msra.mxu1 %v1500_v11  ;;  %v1457_v4 = vld [vmem:[#allocation4 + $0x658] sm:$0xff]  ;;  %v1456_v6 = vld [vmem:[#allocation4 + $0x650] sm:$0xff] }
 0x21f   : > { %2110 = vmatprep.subr.mxu0 %v1369_v12  ;;  %2181 = vmatprep.subr.mxu1 %v1497_v13  ;;  %v1325_v9 = vld [vmem:[#allocation4 + $0x238] sm:$0xff]  ;;  %v1324_v11 = vld [vmem:[#allocation4 + $0x230] sm:$0xff] }
 0x220   : > { %2111 = vmatpush2.msra.mxu0 %v1368_v14  ;;  %2182 = vmatpush2.msra.mxu1 %v1496_v15  ;;  %v1453_v10 = vld [vmem:[#allocation4 + $0x638] sm:$0xff]  ;;  %v1452_v12 = vld [vmem:[#allocation4 + $0x630] sm:$0xff] }
 0x221   : > { %2112 = vmatprep.subr.mxu0 %v1365_v17  ;;  %2183 = vmatprep.subr.mxu1 %v1493_v18  ;;  %v1321_v13 = vld [vmem:[#allocation4 + $0x218] sm:$0xff]  ;;  %v1320_v15 = vld [vmem:[#allocation4 + $0x210] sm:$0xff] }
 0x222   : > { %2113 = vmatpush2.msra.mxu0 %v1364_v19  ;;  %2184 = vmatpush2.msra.mxu1 %v1492_v20  ;;  %v1449_v14 = vld [vmem:[#allocation4 + $0x618] sm:$0xff]  ;;  %v1448_v17 = vld [vmem:[#allocation4 + $0x610] sm:$0xff] }
 0x223   : > { %2114 = vmatprep.subr.mxu0 %v1361_v21  ;;  %2185 = vmatprep.subr.mxu1 %v1489_v22  ;;  %v1573_v18 = vld [vmem:[#allocation4 + $0x9f8] sm:$0xff]  ;;  %v1572_v20 = vld [vmem:[#allocation4 + $0x9f0] sm:$0xff] }
 0x224   : > { %2115 = vmatpush2.msra.mxu0 %v1360_v23  ;;  %2186 = vmatpush2.msra.mxu1 %v1488_v24  ;;  %v1701_v19 = vld [vmem:[#allocation4 + $0xdf8] sm:$0xff]  ;;  %v1700_v21 = vld [vmem:[#allocation4 + $0xdf0] sm:$0xff] }
 0x225   : > { %2116 = vmatprep.subr.mxu0 %v1357_v25  ;;  %2187 = vmatprep.subr.mxu1 %v1485_v26  ;;  %v1569_v22 = vld [vmem:[#allocation4 + $0x9d8] sm:$0xff]  ;;  %v1568_v24 = vld [vmem:[#allocation4 + $0x9d0] sm:$0xff] }
 0x226   : > { %2117 = vmatpush2.msra.mxu0 %v1356_v27  ;;  %2188 = vmatpush2.msra.mxu1 %v1484_v30  ;;  %v1697_v23 = vld [vmem:[#allocation4 + $0xdd8] sm:$0xff]  ;;  %v1696_v25 = vld [vmem:[#allocation4 + $0xdd0] sm:$0xff] }
 0x227   : > { %2118 = vmatprep.subr.mxu0 %v1353_v31  ;;  %2189 = vmatprep.subr.mxu1 %v1481_v32  ;;  %v1561_v26 = vld [vmem:[#allocation4 + $0x998] sm:$0xff] }
 0x228   : > { %2119 = vmatpush2.msra.mxu0 %v1352_v37  ;;  %2190 = vmatpush2.msra.mxu1 %v1480_v38  ;;  %v1689_v27 = vld [vmem:[#allocation4 + $0xd98] sm:$0xff]  ;;  %v1552_v38 = vld [vmem:[#allocation4 + $0x950] sm:$0xff] }
 0x229   : > { %2120 = vmatprep.subr.mxu0 %v1349_v39  ;;  %2191 = vmatprep.subr.mxu1 %v1477_v40  ;;  %v1557_v30 = vld [vmem:[#allocation4 + $0x978] sm:$0xff]  ;;  %v1680_v39 = vld [vmem:[#allocation4 + $0xd50] sm:$0xff] }
 0x22a   : > { %2121 = vmatpush2.msra.mxu0 %v1348_v41  ;;  %2192 = vmatpush2.msra.mxu1 %v1476_v44  ;;  %v1685_v31 = vld [vmem:[#allocation4 + $0xd78] sm:$0xff]  ;;  %v1548_v44 = vld [vmem:[#allocation4 + $0x930] sm:$0xff] }
 0x22b   : > { %2122 = vmatprep.subr.mxu0 %v1345_v45  ;;  %2193 = vmatprep.subr.mxu1 %v1473_v50  ;;  %v1553_v32 = vld [vmem:[#allocation4 + $0x958] sm:$0xff]  ;;  %v1676_v45 = vld [vmem:[#allocation4 + $0xd30] sm:$0xff] }
 0x22c   : > { %2123 = vmatpush2.msra.mxu0 %v1344_v51  ;;  %2194 = vmatpush2.msra.mxu1 %v1472_v54  ;;  %v1681_v37 = vld [vmem:[#allocation4 + $0xd58] sm:$0xff]  ;;  %v1544_v54 = vld [vmem:[#allocation4 + $0x910] sm:$0xff] }
 0x22d   : > { %2124 = vmatprep.subr.mxu0 %v1341_v55  ;;  %2195 = vmatprep.subr.mxu1 %v1469_v56  ;;  %v1549_v40 = vld [vmem:[#allocation4 + $0x938] sm:$0xff]  ;;  %v1672_v55 = vld [vmem:[#allocation4 + $0xd10] sm:$0xff] }
 0x22e   : > { %2125 = vmatpush2.msra.mxu0 %v1340_v57  ;;  %2196 = vmatpush2.msra.mxu1 %v1468_v60  ;;  %v1677_v41 = vld [vmem:[#allocation4 + $0xd38] sm:$0xff]  ;;  %v1540_v60 = vld [vmem:[#allocation4 + $0x8f0] sm:$0xff] }
 0x22f   : > { %2126 = vmatprep.subr.mxu0 %v1337_v34  ;;  %2197 = vmatprep.subr.mxu1 %v1465_v42  ;;  %v1545_v50 = vld [vmem:[#allocation4 + $0x918] sm:$0xff]  ;;  %v1668_v34 = vld [vmem:[#allocation4 + $0xcf0] sm:$0xff] }
 0x230   : > { %2127 = vmatpush2.msra.mxu0 %v1336_v61  ;;  %2198 = vmatpush2.msra.mxu1 %v1464_v62  ;;  %v1673_v51 = vld [vmem:[#allocation4 + $0xd18] sm:$0xff]  ;;  %v1536_v62 = vld [vmem:[#allocation4 + $0x8d0] sm:$0xff] }
 0x231   : > { %2128 = vmatprep.subr.mxu0 %v1333_v35  ;;  %2199 = vmatprep.subr.mxu1 %v1461_v43  ;;  %v1541_v56 = vld [vmem:[#allocation4 + $0x8f8] sm:$0xff]  ;;  %v1664_v35 = vld [vmem:[#allocation4 + $0xcd0] sm:$0xff] }
 0x232   : > { %2129 = vmatpush2.msra.mxu0 %v1332_v63  ;;  %2200 = vmatpush2.msra.mxu1 %v1460_v0  ;;  %v1669_v57 = vld [vmem:[#allocation4 + $0xcf8] sm:$0xff]  ;;  %v1532_v0 = vld [vmem:[#allocation4 + $0x8b0] sm:$0xff] }
 0x233   : > { %2130 = vmatprep.subr.mxu0 %v1329_v1  ;;  %2201 = vmatprep.subr.mxu1 %v1457_v4  ;;  %v1537_v42 = vld [vmem:[#allocation4 + $0x8d8] sm:$0xff]  ;;  %v1660_v1 = vld [vmem:[#allocation4 + $0xcb0] sm:$0xff] }
 0x234   : > { %2131 = vmatpush2.msra.mxu0 %v1328_v5  ;;  %2202 = vmatpush2.msra.mxu1 %v1456_v6  ;;  %v1665_v61 = vld [vmem:[#allocation4 + $0xcd8] sm:$0xff]  ;;  %v1528_v6 = vld [vmem:[#allocation4 + $0x890] sm:$0xff] }
 0x235   : > { %2132 = vmatprep.subr.mxu0 %v1325_v9  ;;  %2203 = vmatprep.subr.mxu1 %v1453_v10  ;;  %v1533_v43 = vld [vmem:[#allocation4 + $0x8b8] sm:$0xff]  ;;  %v1656_v9 = vld [vmem:[#allocation4 + $0xc90] sm:$0xff] }
 0x236   : > { %2133 = vmatpush2.msra.mxu0 %v1324_v11  ;;  %2204 = vmatpush2.msra.mxu1 %v1452_v12  ;;  %v1661_v63 = vld [vmem:[#allocation4 + $0xcb8] sm:$0xff]  ;;  %v1524_v12 = vld [vmem:[#allocation4 + $0x870] sm:$0xff] }
 0x237   : > { %2134 = vmatprep.subr.mxu0 %v1321_v13  ;;  %2205 = vmatprep.subr.mxu1 %v1449_v14  ;;  %v1529_v4 = vld [vmem:[#allocation4 + $0x898] sm:$0xff]  ;;  %v1652_v13 = vld [vmem:[#allocation4 + $0xc70] sm:$0xff] }
 0x238   : > { %2135 = vmatpush2.msra.mxu0 %v1320_v15  ;;  %2206 = vmatpush2.msra.mxu1 %v1448_v17  ;;  %v1657_v5 = vld [vmem:[#allocation4 + $0xc98] sm:$0xff]  ;;  %v1520_v17 = vld [vmem:[#allocation4 + $0x850] sm:$0xff] }
 0x239   : > { %2137 = vmatmul.mubr.f32.vlgmr.msra.gmra.mxu0 %v1246_v46  ;;  %2208 = vmatmul.mubr.f32.vlgmr.msra.gmra.mxu1 %v1248_v47  ;;  %v1693_v46 = vld [vmem:[#allocation4 + $0xdb8] sm:$0xff]  ;;  %v1692_v47 = vld [vmem:[#allocation4 + $0xdb0] sm:$0xff] }
 0x23a   : > { %2214 = vmatprep.subr.mxu0 %v1573_v18  ;;  %2285 = vmatprep.subr.mxu1 %v1701_v19  ;;  %v1525_v10 = vld [vmem:[#allocation4 + $0x878] sm:$0xff]  ;;  %v1648_v18 = vld [vmem:[#allocation4 + $0xc50] sm:$0xff] }
 0x23b   : > { %2215 = vmatpush1.msra.mxu0 %v1572_v20  ;;  %2278 = vmatprep.mubr.f32.mxu0 %v1251_v58  ;;  %v1688_v58 = vld [vmem:[#allocation4 + $0xd90] sm:$0xff]  ;;  %v1653_v11 = vld [vmem:[#allocation4 + $0xc78] sm:$0xff] }
 0x23c   : > { %2286 = vmatpush1.msra.mxu1 %v1700_v21  ;;  %2349 = vmatprep.mubr.f32.mxu1 %v1253_v59  ;;  %v1684_v59 = vld [vmem:[#allocation4 + $0xd70] sm:$0xff]  ;;  %v1521_v14 = vld [vmem:[#allocation4 + $0x858] sm:$0xff] }
 0x23d   : > { %2216 = vmatprep.subr.mxu0 %v1569_v22  ;;  %2287 = vmatprep.subr.mxu1 %v1697_v23  ;;  %v1649_v15 = vld [vmem:[#allocation4 + $0xc58] sm:$0xff]  ;;  %v1516_v21 = vld [vmem:[#allocation4 + $0x830] sm:$0xff] }
 0x23e   : > { %2217 = vmatpush1.msra.mxu0 %v1568_v24  ;;  %2288 = vmatpush1.msra.mxu1 %v1696_v25  ;;  %v1517_v19 = vld [vmem:[#allocation4 + $0x838] sm:$0xff]  ;;  %v1644_v22 = vld [vmem:[#allocation4 + $0xc30] sm:$0xff] }
 0x23f   : > { %2218 = vmatprep.subr.mxu0 %v1565_v28  ;;  %2289 = vmatprep.subr.mxu1 %v1693_v46  ;;  %v1645_v20 = vld [vmem:[#allocation4 + $0xc38] sm:$0xff]  ;;  %v1512_v25 = vld [vmem:[#allocation4 + $0x810] sm:$0xff] }
 0x240   : > { %2219 = vmatpush1.msra.mxu0 %v1564_v29  ;;  %2290 = vmatpush1.msra.mxu1 %v1692_v47  ;;  %v1513_v23 = vld [vmem:[#allocation4 + $0x818] sm:$0xff]  ;;  %v1640_v28 = vld [vmem:[#allocation4 + $0xc10] sm:$0xff] }
 0x241   : > { %2220 = vmatprep.subr.mxu0 %v1561_v26  ;;  %2291 = vmatprep.subr.mxu1 %v1689_v27  ;;  %v1641_v24 = vld [vmem:[#allocation4 + $0xc18] sm:$0xff]  ;;  %v1636_v47 = vld [vmem:[#allocation4 + $0xbf0] sm:$0xff] }
 0x242   : > { %2221 = vmatpush1.msra.mxu0 %v1560_v52  ;;  %2292 = vmatpush1.msra.mxu1 %v1688_v58  ;;  %v1637_v46 = vld [vmem:[#allocation4 + $0xbf8] sm:$0xff]  ;;  %v1764_v26 = vld [vmem:[#allocation4 + $0xff0] sm:$0xff] }
 0x243   : > { %2222 = vmatprep.subr.mxu0 %v1557_v30  ;;  %2293 = vmatprep.subr.mxu1 %v1685_v31  ;;  %v1765_v29 = vld [vmem:[#allocation4 + $0xff8] sm:$0xff]  ;;  %v1632_v58 = vld [vmem:[#allocation4 + $0xbd0] sm:$0xff] }
 0x244   : > { %2223 = vmatpush1.msra.mxu0 %v1556_v53  ;;  %2294 = vmatpush1.msra.mxu1 %v1684_v59  ;;  %v1633_v27 = vld [vmem:[#allocation4 + $0xbd8] sm:$0xff]  ;;  %v1760_v30 = vld [vmem:[#allocation4 + $0xfd0] sm:$0xff] }
 0x245   : > { %2224 = vmatprep.subr.mxu0 %v1553_v32  ;;  %2295 = vmatprep.subr.mxu1 %v1681_v37  ;;  %v1761_v52 = vld [vmem:[#allocation4 + $0xfd8] sm:$0xff]  ;;  %v1628_v59 = vld [vmem:[#allocation4 + $0xbb0] sm:$0xff] }
 0x246   : > { %2225 = vmatpush1.msra.mxu0 %v1552_v38  ;;  %2296 = vmatpush1.msra.mxu1 %v1680_v39  ;;  %v1629_v31 = vld [vmem:[#allocation4 + $0xbb8] sm:$0xff]  ;;  %v1756_v32 = vld [vmem:[#allocation4 + $0xfb0] sm:$0xff] }
 0x247   : > { %2226 = vmatprep.subr.mxu0 %v1549_v40  ;;  %2297 = vmatprep.subr.mxu1 %v1677_v41  ;;  %v1757_v53 = vld [vmem:[#allocation4 + $0xfb8] sm:$0xff]  ;;  %v1624_v39 = vld [vmem:[#allocation4 + $0xb90] sm:$0xff] }
 0x248   : > { %2227 = vmatpush1.msra.mxu0 %v1548_v44  ;;  %2298 = vmatpush1.msra.mxu1 %v1676_v45  ;;  %v1625_v37 = vld [vmem:[#allocation4 + $0xb98] sm:$0xff]  ;;  %v1752_v40 = vld [vmem:[#allocation4 + $0xf90] sm:$0xff] }
 0x249   : > { %2228 = vmatprep.subr.mxu0 %v1545_v50  ;;  %2299 = vmatprep.subr.mxu1 %v1673_v51  ;;  %v1753_v38 = vld [vmem:[#allocation4 + $0xf98] sm:$0xff]  ;;  %v1620_v45 = vld [vmem:[#allocation4 + $0xb70] sm:$0xff] }
 0x24a   : > { %2229 = vmatpush1.msra.mxu0 %v1544_v54  ;;  %2300 = vmatpush1.msra.mxu1 %v1672_v55  ;;  %v1621_v41 = vld [vmem:[#allocation4 + $0xb78] sm:$0xff]  ;;  %v1748_v50 = vld [vmem:[#allocation4 + $0xf70] sm:$0xff] }
 0x24b   : > { %2230 = vmatprep.subr.mxu0 %v1541_v56  ;;  %2301 = vmatprep.subr.mxu1 %v1669_v57  ;;  %v1749_v44 = vld [vmem:[#allocation4 + $0xf78] sm:$0xff]  ;;  %v1616_v55 = vld [vmem:[#allocation4 + $0xb50] sm:$0xff] }
 0x24c   : > { %2231 = vmatpush1.msra.mxu0 %v1540_v60  ;;  %2302 = vmatpush1.msra.mxu1 %v1668_v34  ;;  %v1617_v51 = vld [vmem:[#allocation4 + $0xb58] sm:$0xff]  ;;  %v1744_v56 = vld [vmem:[#allocation4 + $0xf50] sm:$0xff] }
 0x24d   : > { %2232 = vmatprep.subr.mxu0 %v1537_v42  ;;  %2303 = vmatprep.subr.mxu1 %v1665_v61  ;;  %v1745_v54 = vld [vmem:[#allocation4 + $0xf58] sm:$0xff]  ;;  %v1612_v34 = vld [vmem:[#allocation4 + $0xb30] sm:$0xff] }
 0x24e   : > { %2233 = vmatpush1.msra.mxu0 %v1536_v62  ;;  %2304 = vmatpush1.msra.mxu1 %v1664_v35  ;;  %v1613_v57 = vld [vmem:[#allocation4 + $0xb38] sm:$0xff]  ;;  %v1740_v42 = vld [vmem:[#allocation4 + $0xf30] sm:$0xff] }
 0x24f   : > { %2234 = vmatprep.subr.mxu0 %v1533_v43  ;;  %2305 = vmatprep.subr.mxu1 %v1661_v63  ;;  %v1741_v60 = vld [vmem:[#allocation4 + $0xf38] sm:$0xff]  ;;  %v1608_v35 = vld [vmem:[#allocation4 + $0xb10] sm:$0xff] }
 0x250   : > { %2235 = vmatpush1.msra.mxu0 %v1532_v0  ;;  %2306 = vmatpush1.msra.mxu1 %v1660_v1  ;;  %v1609_v61 = vld [vmem:[#allocation4 + $0xb18] sm:$0xff]  ;;  %v1736_v43 = vld [vmem:[#allocation4 + $0xf10] sm:$0xff] }
 0x251   : > { %2236 = vmatprep.subr.mxu0 %v1529_v4  ;;  %2307 = vmatprep.subr.mxu1 %v1657_v5  ;;  %v1737_v62 = vld [vmem:[#allocation4 + $0xf18] sm:$0xff]  ;;  %v1604_v1 = vld [vmem:[#allocation4 + $0xaf0] sm:$0xff] }
 0x252   : > { %2237 = vmatpush1.msra.mxu0 %v1528_v6  ;;  %2308 = vmatpush1.msra.mxu1 %v1656_v9  ;;  %v1605_v63 = vld [vmem:[#allocation4 + $0xaf8] sm:$0xff]  ;;  %v1732_v4 = vld [vmem:[#allocation4 + $0xef0] sm:$0xff] }
 0x253   : > { %2238 = vmatprep.subr.mxu0 %v1525_v10  ;;  %2309 = vmatprep.subr.mxu1 %v1653_v11  ;;  %v1733_v0 = vld [vmem:[#allocation4 + $0xef8] sm:$0xff]  ;;  %v1600_v9 = vld [vmem:[#allocation4 + $0xad0] sm:$0xff] }
 0x254   : > { %2239 = vmatpush1.msra.mxu0 %v1524_v12  ;;  %2310 = vmatpush1.msra.mxu1 %v1652_v13  ;;  %v1601_v5 = vld [vmem:[#allocation4 + $0xad8] sm:$0xff]  ;;  %v1728_v10 = vld [vmem:[#allocation4 + $0xed0] sm:$0xff] }
 0x255   : > { %2240 = vmatprep.subr.mxu0 %v1521_v14  ;;  %2311 = vmatprep.subr.mxu1 %v1649_v15  ;;  %v1729_v6 = vld [vmem:[#allocation4 + $0xed8] sm:$0xff]  ;;  %v1596_v13 = vld [vmem:[#allocation4 + $0xab0] sm:$0xff] }
 0x256   : > { %2241 = vmatpush1.msra.mxu0 %v1520_v17  ;;  %2312 = vmatpush1.msra.mxu1 %v1648_v18  ;;  %v1597_v11 = vld [vmem:[#allocation4 + $0xab8] sm:$0xff]  ;;  %v1724_v14 = vld [vmem:[#allocation4 + $0xeb0] sm:$0xff] }
 0x257   : > { %2242 = vmatprep.subr.mxu0 %v1517_v19  ;;  %2313 = vmatprep.subr.mxu1 %v1645_v20  ;;  %v1725_v12 = vld [vmem:[#allocation4 + $0xeb8] sm:$0xff]  ;;  %v1592_v18 = vld [vmem:[#allocation4 + $0xa90] sm:$0xff] }
 0x258   : > { %2243 = vmatpush1.msra.mxu0 %v1516_v21  ;;  %2314 = vmatpush1.msra.mxu1 %v1644_v22  ;;  %v1593_v15 = vld [vmem:[#allocation4 + $0xa98] sm:$0xff]  ;;  %v1720_v19 = vld [vmem:[#allocation4 + $0xe90] sm:$0xff] }
 0x259   : > { %2244 = vmatprep.subr.mxu0 %v1513_v23  ;;  %2315 = vmatprep.subr.mxu1 %v1641_v24  ;;  %v1721_v17 = vld [vmem:[#allocation4 + $0xe98] sm:$0xff]  ;;  %v1588_v22 = vld [vmem:[#allocation4 + $0xa70] sm:$0xff] }
 0x25a   : > { %2245 = vmatpush1.msra.mxu0 %v1512_v25  ;;  %2316 = vmatpush1.msra.mxu1 %v1640_v28  ;;  %v1589_v20 = vld [vmem:[#allocation4 + $0xa78] sm:$0xff]  ;;  %v1716_v23 = vld [vmem:[#allocation4 + $0xe70] sm:$0xff] }
 0x25b   : > { %2246 = vmatprep.subr.mxu0 %v1637_v46  ;;  %2317 = vmatprep.subr.mxu1 %v1765_v29  ;;  %v1717_v21 = vld [vmem:[#allocation4 + $0xe78] sm:$0xff]  ;;  %v1584_v28 = vld [vmem:[#allocation4 + $0xa50] sm:$0xff] }
 0x25c   : > { %2247 = vmatpush2.msra.mxu0 %v1636_v47  ;;  %2318 = vmatpush2.msra.mxu1 %v1764_v26  ;;  %v1585_v24 = vld [vmem:[#allocation4 + $0xa58] sm:$0xff]  ;;  %v1712_v46 = vld [vmem:[#allocation4 + $0xe50] sm:$0xff] }
 0x25d   : > { %2248 = vmatprep.subr.mxu0 %v1633_v27  ;;  %2319 = vmatprep.subr.mxu1 %v1761_v52  ;;  %v1713_v25 = vld [vmem:[#allocation4 + $0xe58] sm:$0xff]  ;;  %v1580_v26 = vld [vmem:[#allocation4 + $0xa30] sm:$0xff] }
 0x25e   : > { %2249 = vmatpush2.msra.mxu0 %v1632_v58  ;;  %2320 = vmatpush2.msra.mxu1 %v1760_v30  ;;  %v1581_v29 = vld [vmem:[#allocation4 + $0xa38] sm:$0xff]  ;;  %v1708_v27 = vld [vmem:[#allocation4 + $0xe30] sm:$0xff] }
 0x25f   : > { %2250 = vmatprep.subr.mxu0 %v1629_v31  ;;  %2321 = vmatprep.subr.mxu1 %v1757_v53  ;;  %v1709_v47 = vld [vmem:[#allocation4 + $0xe38] sm:$0xff]  ;;  %v1576_v30 = vld [vmem:[#allocation4 + $0xa10] sm:$0xff] }
 0x260   : > { %2251 = vmatpush2.msra.mxu0 %v1628_v59  ;;  %2322 = vmatpush2.msra.mxu1 %v1756_v32  ;;  %v1577_v52 = vld [vmem:[#allocation4 + $0xa18] sm:$0xff]  ;;  %v1704_v31 = vld [vmem:[#allocation4 + $0xe10] sm:$0xff]  ;;  %v2390_v32 = vld [vmem:[%s3550_s9 + $0xf0] sm:$0xff] }
 0x261   : > { %2252 = vmatprep.subr.mxu0 %v1625_v37  ;;  %2323 = vmatprep.subr.mxu1 %v1753_v38  ;;  %v1705_v58 = vld [vmem:[#allocation4 + $0xe18] sm:$0xff]  ;;  %v2391_v53 = vld [vmem:[%s3550_s9 + $0xf8] sm:$0xff]  ;;  %v2374_v37 = vld [vmem:[%s3550_s9 + $0x70] sm:$0xff] }
 0x262   : > { %2253 = vmatpush2.msra.mxu0 %v1624_v39  ;;  %2324 = vmatpush2.msra.mxu1 %v1752_v40  ;;  %v2375_v59 = vld [vmem:[%s3550_s9 + $0x78] sm:$0xff]  ;;  %v2389_v38 = vld [vmem:[%s3550_s9 + $0xe8] sm:$0xff]  ;;  %v2388_v39 = vld [vmem:[%s3550_s9 + $0xe0] sm:$0xff] }
 0x263   : > { %2254 = vmatprep.subr.mxu0 %v1621_v41  ;;  %2325 = vmatprep.subr.mxu1 %v1749_v44  ;;  %v2373_v48 = vld [vmem:[%s3550_s9 + $0x68] sm:$0xff]  ;;  %v2406_v40 = vld [vmem:[%s3550_s9 + $0x170] sm:$0xff]  ;;  %v2372_v41 = vld [vmem:[%s3550_s9 + $0x60] sm:$0xff] }
 0x264   : > { %2255 = vmatpush2.msra.mxu0 %v1620_v45  ;;  %2326 = vmatpush2.msra.mxu1 %v1748_v50  ;;  %v2421_v44 = vld [vmem:[%s3550_s9 + $0x1e8] sm:$0xff]  ;;  %v2387_v45 = vld [vmem:[%s3550_s9 + $0xd8] sm:$0xff] }
 0x265   : > { %2256 = vmatprep.subr.mxu0 %v1617_v51  ;;  %2327 = vmatprep.subr.mxu1 %v1745_v54  ;;  %v2405_v50 = vld [vmem:[%s3550_s9 + $0x168] sm:$0xff]  ;;  %v2371_v51 = vld [vmem:[%s3550_s9 + $0x58] sm:$0xff]  ;;  %v2420_v54 = vld [vmem:[%s3550_s9 + $0x1e0] sm:$0xff] }
 0x266   : > { %2257 = vmatpush2.msra.mxu0 %v1616_v55  ;;  %2328 = vmatpush2.msra.mxu1 %v1744_v56  ;;  %v2386_v55 = vld [vmem:[%s3550_s9 + $0xd0] sm:$0xff]  ;;  %v2404_v56 = vld [vmem:[%s3550_s9 + $0x160] sm:$0xff] }
 0x267   : > { %2258 = vmatprep.subr.mxu0 %v1613_v57  ;;  %2329 = vmatprep.subr.mxu1 %v1741_v60  ;;  %v2370_v57 = vld [vmem:[%s3550_s9 + $0x50] sm:$0xff]  ;;  %v2419_v60 = vld [vmem:[%s3550_s9 + $0x1d8] sm:$0xff] }
 0x268   : > { %2259 = vmatpush2.msra.mxu0 %v1612_v34  ;;  %2330 = vmatpush2.msra.mxu1 %v1740_v42  ;;  %v2385_v34 = vld [vmem:[%s3550_s9 + $0xc8] sm:$0xff]  ;;  %v2403_v42 = vld [vmem:[%s3550_s9 + $0x158] sm:$0xff] }
 0x269   : > { %2260 = vmatprep.subr.mxu0 %v1609_v61  ;;  %2331 = vmatprep.subr.mxu1 %v1737_v62  ;;  %v2369_v61 = vld [vmem:[%s3550_s9 + $0x48] sm:$0xff]  ;;  %v2418_v62 = vld [vmem:[%s3550_s9 + $0x1d0] sm:$0xff] }
 0x26a   : > { %2261 = vmatpush2.msra.mxu0 %v1608_v35  ;;  %2332 = vmatpush2.msra.mxu1 %v1736_v43  ;;  %v2384_v35 = vld [vmem:[%s3550_s9 + $0xc0] sm:$0xff]  ;;  %v2402_v43 = vld [vmem:[%s3550_s9 + $0x150] sm:$0xff] }
 0x26b   : > { %2262 = vmatprep.subr.mxu0 %v1605_v63  ;;  %2333 = vmatprep.subr.mxu1 %v1733_v0  ;;  %v2368_v63 = vld [vmem:[%s3550_s9 + $0x40] sm:$0xff]  ;;  %v2417_v0 = vld [vmem:[%s3550_s9 + $0x1c8] sm:$0xff] }
 0x26c   : > { %2263 = vmatpush2.msra.mxu0 %v1604_v1  ;;  %2334 = vmatpush2.msra.mxu1 %v1732_v4  ;;  %v2383_v1 = vld [vmem:[%s3550_s9 + $0xb8] sm:$0xff]  ;;  %v2401_v4 = vld [vmem:[%s3550_s9 + $0x148] sm:$0xff] }
 0x26d   : > { %2264 = vmatprep.subr.mxu0 %v1601_v5  ;;  %2335 = vmatprep.subr.mxu1 %v1729_v6  ;;  %v2367_v5 = vld [vmem:[%s3550_s9 + $0x38] sm:$0xff]  ;;  %v2416_v6 = vld [vmem:[%s3550_s9 + $0x1c0] sm:$0xff] }
 0x26e   : > { %2265 = vmatpush2.msra.mxu0 %v1600_v9  ;;  %2336 = vmatpush2.msra.mxu1 %v1728_v10  ;;  %v2382_v9 = vld [vmem:[%s3550_s9 + $0xb0] sm:$0xff]  ;;  %v2400_v10 = vld [vmem:[%s3550_s9 + $0x140] sm:$0xff] }
 0x26f   : > { %2266 = vmatprep.subr.mxu0 %v1597_v11  ;;  %2337 = vmatprep.subr.mxu1 %v1725_v12  ;;  %v2366_v11 = vld [vmem:[%s3550_s9 + $0x30] sm:$0xff]  ;;  %v2415_v12 = vld [vmem:[%s3550_s9 + $0x1b8] sm:$0xff] }
 0x270   : > { %2267 = vmatpush2.msra.mxu0 %v1596_v13  ;;  %2338 = vmatpush2.msra.mxu1 %v1724_v14  ;;  %v2381_v13 = vld [vmem:[%s3550_s9 + $0xa8] sm:$0xff]  ;;  %v2399_v14 = vld [vmem:[%s3550_s9 + $0x138] sm:$0xff] }
 0x271   : > { %2268 = vmatprep.subr.mxu0 %v1593_v15  ;;  %2339 = vmatprep.subr.mxu1 %v1721_v17  ;;  %v2365_v15 = vld [vmem:[%s3550_s9 + $0x28] sm:$0xff]  ;;  %v2414_v17 = vld [vmem:[%s3550_s9 + $0x1b0] sm:$0xff] }
 0x272   : > { %2269 = vmatpush2.msra.mxu0 %v1592_v18  ;;  %2340 = vmatpush2.msra.mxu1 %v1720_v19  ;;  %v2380_v18 = vld [vmem:[%s3550_s9 + $0xa0] sm:$0xff]  ;;  %v2398_v19 = vld [vmem:[%s3550_s9 + $0x130] sm:$0xff] }
 0x273   : > { %2270 = vmatprep.subr.mxu0 %v1589_v20  ;;  %2341 = vmatprep.subr.mxu1 %v1717_v21  ;;  %v2364_v20 = vld [vmem:[%s3550_s9 + $0x20] sm:$0xff]  ;;  %v2413_v21 = vld [vmem:[%s3550_s9 + $0x1a8] sm:$0xff] }
 0x274   : > { %2271 = vmatpush2.msra.mxu0 %v1588_v22  ;;  %2342 = vmatpush2.msra.mxu1 %v1716_v23  ;;  %v2379_v22 = vld [vmem:[%s3550_s9 + $0x98] sm:$0xff]  ;;  %v2397_v23 = vld [vmem:[%s3550_s9 + $0x128] sm:$0xff] }
 0x275   : > { %2272 = vmatprep.subr.mxu0 %v1585_v24  ;;  %2343 = vmatprep.subr.mxu1 %v1713_v25  ;;  %v2363_v24 = vld [vmem:[%s3550_s9 + $0x18] sm:$0xff]  ;;  %v2378_v25 = vld [vmem:[%s3550_s9 + $0x90] sm:$0xff] }
 0x276   : > { %2273 = vmatpush2.msra.mxu0 %v1584_v28  ;;  %2344 = vmatpush2.msra.mxu1 %v1712_v46  ;;  %v2362_v28 = vld [vmem:[%s3550_s9 + $0x10] sm:$0xff]  ;;  %v2377_v46 = vld [vmem:[%s3550_s9 + $0x88] sm:$0xff] }
 0x277   : > { %2274 = vmatprep.subr.mxu0 %v1581_v29  ;;  %2345 = vmatprep.subr.mxu1 %v1709_v47  ;;  %v2361_v29 = vld [vmem:[%s3550_s9 + $0x8] sm:$0xff]  ;;  %v2376_v47 = vld [vmem:[%s3550_s9 + $0x80] sm:$0xff] }
 0x278   : > { %2275 = vmatpush2.msra.mxu0 %v1580_v26  ;;  %2346 = vmatpush2.msra.mxu1 %v1708_v27  ;;  %v2360_v26 = vld [vmem:[%s3550_s9] sm:$0xff]  ;;  %v1766_v27 = vld [vmem:[#allocation7] sm:$0xf] }
 0x279   : > { %2276 = vmatprep.subr.mxu0 %v1577_v52  ;;  %2347 = vmatprep.subr.mxu1 %v1705_v58  ;;  %v1854_v52 = vpop.f32.mrf.mxu0  ;;  %v1771_v58 = vrot.slane %v1766_v27, %v1200_v2 }
 0x27a   : > { %2277 = vmatpush2.msra.mxu0 %v1576_v30  ;;  %2348 = vmatpush2.msra.mxu1 %v1704_v31  ;;  %v1775_v30 = vrot.slane %v1766_v27, %v1204_v7  ;;  %v1925_v31 = vpop.f32.mrf.mxu1  ;;  %v2396_v7 = vld [vmem:[%s3550_s9 + $0x120] sm:$0xff] }
 0x27b   : > { %2279 = vmatmul.mubr.f32.vlgmr.msra.gmra.mxu0 %v1250_v33  ;;  %2350 = vmatmul.mubr.f32.vlgmr.msra.gmra.mxu1 %v1252_v36  ;;  %v2407_v33 = vld [vmem:[%s3550_s9 + $0x178] sm:$0xff]  ;;  %v2422_v36 = vld [vmem:[%s3550_s9 + $0x1f0] sm:$0xff] }
 0x27c   : > { %2730 = vmatprep.subr.mxu0 %v2391_v53  ;;  %2765 = vmatprep.subr.mxu1 %v2423_v49  ;;  %v1856_v53 = vpop.f32.mrf.mxu0 }
 0x27d   : > { %2731 = vmatpush3.msra.mxu0 %v2375_v59  ;;  %2766 = vmatpush3.msra.mxu1 %v2407_v33  ;;  %v1855_v59 = vadd.f32 %v1854_v52, %v1771_v58 }
 0x27e   : > { %2732 = vmatprep.subr.mxu0 %v2390_v32  ;;  %2767 = vmatprep.subr.mxu1 %v2422_v36  ;;  %v1857_v32 = vadd.f32 %v1856_v53, %v1775_v30 }
 0x27f   : > { %2733 = vmatpush3.msra.mxu0 %v2374_v37  ;;  %2768 = vmatpush3.msra.mxu1 %v2406_v40  ;;  %v1927_v37 = vpop.f32.mrf.mxu1 }
 0x280   : > { %2734 = vmatprep.subr.mxu0 %v2389_v38  ;;  %2769 = vmatprep.subr.mxu1 %v2421_v44  ;;  %v1926_v38 = vadd.f32 %v1925_v31, %v1855_v59  ;;  %v1928_v33 = vadd.f32 %v1927_v37, %v1857_v32 }
 0x281   : > { %2735 = vmatpush3.msra.mxu0 %v2373_v48  ;;  %2770 = vmatpush3.msra.mxu1 %v2405_v50  ;;  %v2411_v50 = vld [vmem:[%s3550_s9 + $0x198] sm:$0xff] }
 0x282   : > { %2736 = vmatprep.subr.mxu0 %v2388_v39  ;;  %2771 = vmatprep.subr.mxu1 %v2420_v54 }
 0x283   : > { %2737 = vmatpush3.msra.mxu0 %v2372_v41  ;;  %2772 = vmatpush3.msra.mxu1 %v2404_v56  ;;  %v2412_v41 = vld [vmem:[%s3550_s9 + $0x1a0] sm:$0xff] }
 0x284   : > { %2738 = vmatprep.subr.mxu0 %v2387_v45  ;;  %2773 = vmatprep.subr.mxu1 %v2419_v60  ;;  %v2409_v60 = vld [vmem:[%s3550_s9 + $0x188] sm:$0xff] }
 0x285   : > { %2739 = vmatpush3.msra.mxu0 %v2371_v51  ;;  %2774 = vmatpush3.msra.mxu1 %v2403_v42  ;;  %v2395_v51 = vld [vmem:[%s3550_s9 + $0x118] sm:$0xff]  ;;  %v2408_v42 = vld [vmem:[%s3550_s9 + $0x180] sm:$0xff] }
 0x286   : > { %2740 = vmatprep.subr.mxu0 %v2386_v55  ;;  %2775 = vmatprep.subr.mxu1 %v2418_v62  ;;  %v2410_v55 = vld [vmem:[%s3550_s9 + $0x190] sm:$0xff] }
 0x287   : > { %2741 = vmatpush3.msra.mxu0 %v2370_v57  ;;  %2776 = vmatpush3.msra.mxu1 %v2402_v43  ;;  %v2394_v57 = vld [vmem:[%s3550_s9 + $0x110] sm:$0xff]  ;;  %v1783_v43 = vrot.slane %v1766_v27, %v1212_v8 }
 0x288   : > { %2742 = vmatprep.subr.mxu0 %v2385_v34  ;;  %2777 = vmatprep.subr.mxu1 %v2417_v0  ;;  %v2393_v34 = vld [vmem:[%s3550_s9 + $0x108] sm:$0xff] }
 0x289   : > { %2743 = vmatpush3.msra.mxu0 %v2369_v61  ;;  %2778 = vmatpush3.msra.mxu1 %v2401_v4  ;;  %v2392_v61 = vld [vmem:[%s3550_s9 + $0x100] sm:$0xff] }
 0x28a   : > { %2744 = vmatprep.subr.mxu0 %v2384_v35  ;;  %2779 = vmatprep.subr.mxu1 %v2416_v6  ;;  %v1779_v35 = vrot.slane %v1766_v27, %v1208_v3 }
 0x28b   : > { %2745 = vmatpush3.msra.mxu0 %v2368_v63  ;;  %2780 = vmatpush3.msra.mxu1 %v2400_v10 }
 0x28c   : > { %2746 = vmatprep.subr.mxu0 %v2383_v1  ;;  %2781 = vmatprep.subr.mxu1 %v2415_v12 }
 0x28d   : > { %2747 = vmatpush3.msra.mxu0 %v2367_v5  ;;  %2782 = vmatpush3.msra.mxu1 %v2399_v14 }
 0x28e   : > { %2748 = vmatprep.subr.mxu0 %v2382_v9  ;;  %2783 = vmatprep.subr.mxu1 %v2414_v17 }
 0x28f   : > { %2749 = vmatpush3.msra.mxu0 %v2366_v11  ;;  %2784 = vmatpush3.msra.mxu1 %v2398_v19 }
 0x290   : > { %2750 = vmatprep.subr.mxu0 %v2381_v13  ;;  %2785 = vmatprep.subr.mxu1 %v2413_v21  ;;  %v2725_v21 = vld [vmem:[#allocation9] ss:$0 sm:$0xff] }
 0x291   : > { %2751 = vmatpush3.msra.mxu0 %v2365_v15  ;;  %2786 = vmatpush3.msra.mxu1 %v2397_v23 }
 0x292   : > { %2752 = vmatprep.subr.mxu0 %v2380_v18  ;;  %2787 = vmatprep.subr.mxu1 %v2412_v41 }
 0x293   : > { %2753 = vmatpush3.msra.mxu0 %v2364_v20  ;;  %2788 = vmatpush3.msra.mxu1 %v2396_v7 }
 0x294   : > { %2754 = vmatprep.subr.mxu0 %v2379_v22  ;;  %2789 = vmatprep.subr.mxu1 %v2411_v50 }
 0x295   : > { %2755 = vmatpush3.msra.mxu0 %v2363_v24  ;;  %2790 = vmatpush3.msra.mxu1 %v2395_v51 }
 0x296   : > { %2756 = vmatprep.subr.mxu0 %v2378_v25  ;;  %2791 = vmatprep.subr.mxu1 %v2410_v55 }
 0x297   : > { %2757 = vmatpush3.msra.mxu0 %v2362_v28  ;;  %2792 = vmatpush3.msra.mxu1 %v2394_v57 }
 0x298   : > { %2758 = vmatprep.subr.mxu0 %v2377_v46  ;;  %2793 = vmatprep.subr.mxu1 %v2409_v60 }
 0x299   : > { %2759 = vmatpush3.msra.mxu0 %v2361_v29  ;;  %2794 = vmatpush3.msra.mxu1 %v2393_v34 }
 0x29a   : > { %2760 = vmatprep.subr.mxu0 %v2376_v47  ;;  %2795 = vmatprep.subr.mxu1 %v2408_v42 }
 0x29b   : > { %2761 = vmatpush3.msra.mxu0 %v2360_v26  ;;  %2796 = vmatpush3.msra.mxu1 %v2392_v61 }
 0x2b7   : > { %v1996_v48 = vpop.f32.mrf.mxu0  ;;  %v2067_v49 = vpop.f32.mrf.mxu1 }
 0x2b8   : > { %v1997_v36 = vadd.f32 %v1996_v48, %v1926_v38 }
 0x2b9   : > { %v1998_v39 = vpop.f32.mrf.mxu0  ;;  %v2069_v44 = vpop.f32.mrf.mxu1 }
 0x2ba   : > { %v1999_v40 = vadd.f32 %v1998_v39, %v1928_v33  ;;  %v2068_v2 = vadd.f32 %v2067_v49, %v1997_v36 }
 0x2bc   : > { %v2070_v45 = vadd.f32 %v2069_v44, %v1999_v40  ;;  %v2356_v56 = vmax.f32 %v2068_v2, 0.0 }
 0x2be   : > { %v2357_v54 = vmax.f32 %v2070_v45, 0.0 }
 0x2c0   : > { %2495 = vmatprep.mubr.f32.mxu0 %v2357_v54 }
 0x2c1   : > { %2496 = vmatmul.mubr.f32.vlgmr.msra.gmra.mxu0 %v2356_v56 }
 0x2f9   : > { %v2138_v62 = vpop.f32.mrf.mxu0  ;;  %v2209_v63 = vpop.f32.mrf.mxu1 }
 0x2fa   : > { %v2139_v1 = vadd.f32 %v2138_v62, %v1779_v35 }
 0x2fb   : > { %v2140_v0 = vpop.f32.mrf.mxu0  ;;  %v2211_v5 = vpop.f32.mrf.mxu1 }
 0x2fc   : > { %v2141_v4 = vadd.f32 %v2140_v0, %v1783_v43  ;;  %v2210_v6 = vadd.f32 %v2209_v63, %v2139_v1 }
 0x2fe   : > { %v2212_v11 = vadd.f32 %v2211_v5, %v2141_v4 }
 0x33b   : > { %v2280_v9 = vpop.f32.mrf.mxu0  ;;  %v2351_v10 = vpop.f32.mrf.mxu1 }
 0x33c   : > { %v2281_v12 = vadd.f32 %v2280_v9, %v2210_v6 }
 0x33d   : > { %v2282_v13 = vpop.f32.mrf.mxu0  ;;  %v2353_v17 = vpop.f32.mrf.mxu1 }
 0x33e   : > { %v2283_v14 = vadd.f32 %v2282_v13, %v2212_v11  ;;  %v2352_v15 = vadd.f32 %v2351_v10, %v2281_v12 }
 0x340   : > { %v2354_v18 = vadd.f32 %v2353_v17, %v2283_v14  ;;  %v2358_v3 = vmax.f32 %v2352_v15, 0.0 }
 0x342   : > { %v2359_v19 = vmax.f32 %v2354_v18, 0.0 }
 0x344   : > { %2565 = vmatprep.mubr.f32.mxu1 %v2359_v19 }
 0x345   : > { %2566 = vmatmul.mubr.f32.vlgmr.msra.gmra.mxu1 %v2358_v3 }
 0x381   : > { %v2762_v16 = vpop.f32.mrf.mxu0 }
 0x383   : > { %v2763_v8 = vpop.f32.mrf.mxu0 }
 0x384   : > { %v2764_v20 = vadd.f32 %v2763_v8, %v2762_v16 }
 0x386   : > { %v2498_v24 = vadd.f32 %v2764_v20, %v2725_v21 }
 0x405   : > { %v2797_v22 = vpop.f32.mrf.mxu1 }
 0x407   : > { %v2798_v23 = vpop.f32.mrf.mxu1 }
 0x408   : > { %v2799_v25 = vadd.f32 %v2798_v23, %v2797_v22 }
 0x40a   : > { %v2568_v28 = vadd.f32 %v2799_v25, %v2498_v24 }
 0x40c   : > { %2572 = vst.msk [vmem:[#allocation10] sm:$0x3] %vm2571_vm4, %v2568_v28 }
 0x40d PF: > { %p3517_p5 = scmp.eq.s32.totalorder %s2687_s22, 1  ;;  %s3015_s14 = smov [#allocation10]  }
 0x40e   : > { %s2582_s26 = sshll.u32 %s3015_s14, 4  ;;  %s2583_s26 = int_to_ptr.vmem [resolvable:$true] %s2582_s26 }
 0x40f   : > { %s2947_s29 = scalar_lea.vmem %s2583_s26, 32  ;;  %p2954_p6 = scmp.lt.s32.totalorder %s2583_s26, %s2583_s26 }
 0x410   : > { %p2948_p10 = scmp.ne.s32.totalorder %s2583_s26, %s2947_s29  ;;  %p2955_p13 = scmp.lt.s32.totalorder %s2947_s29, %s2947_s29 }
 0x412   : > { %p2949_p11 = pnand %p2948_p10, %p3517_p5  ;;  %p2956_p0 = por %p2955_p13, %p2954_p6 }
 0x414   : > { %p2950_p12 = pneg %p2949_p11 }
 0x416   : > { %p2957_p1 = pnand %p2956_p0, %p2950_p12 }
 0x418   : > { %2960 = shalt.err (!%p2957_p1)
}
 0x419   : > { %2813 = dma.vmem_to_hbm [thread:$0]  (%p3517_p5), %s2583_s26, 32, %s3552_s11, [#allocation6]  }
 0x41a   : > { %2992 = dma.done.wait (%p3517_p5), [#allocation6], 32  }
 0x41b   : > { %2994 = vsyncadd (%p3517_p5), [#allocation6], 4294967264 }
 0x41c PF: > { %s24_s19 = sadd.s32 1, %s3005_s19   ;;  %s3558_s17 = smov %s3001_s18 }
 0x41d   : > { %p21_p4 = scmp.ge.s32.totalorder %s24_s19, 4   ;;  %s3559_s18 = smov %s3561_s25 }
 0x41f   :  { %23 = sbr.rel (!%p21_p4) target bundleno = 4 (0x4), region = 116 }
 0x424   :  { %2595 = vsyncpa [#allocation5], 1 }
 0x425   :  { %2597 = vsyncpa [#allocation5 + $0x1], 1 }
 0x426   :  { %2598 = vsyncpa [#allocation8], 1 }
 0x427   :  { %2599 = vsyncpa [#allocation6], 1 }
 0x428   :  { %2601 = vsyncpa [#allocation6 + $0x1], 1 }

</bundles_post_ra>
